<compile_context>
chip_gen: v7x
topology: tpu7x:2x2x1
jax: 0.10.0
libtpu: 0.0.40
codegen_flags: <defaults>
</compile_context>

<pallas_src>
import functools

import numpy as np
import jax
import jax.numpy as jnp
from jax import lax
from jax.experimental import pallas as pl
from jax.experimental.pallas import tpu as pltpu


# ----------------------------------------------------------------------------- helpers
def get_act_func(key):
    funcs = {
        "tanh": jnp.tanh,
        "relu": lambda x: jnp.maximum(x, 0.0),
        "leaky_relu": lambda x: jnp.where(x >= 0, x, 0.01 * x),
        "mish": lambda x: x * jnp.tanh(jax.nn.softplus(x)),
        "gelu": lambda x: jax.nn.gelu(x, approximate=False),
        "softplus": jax.nn.softplus,
    }
    return None if key is None else funcs[key]


def image_output_size(size, num_cnn, k):
    for _ in range(num_cnn):
        size = (size - k + 1) // 2   # VALID conv then 2x2 max-pool (floor)
    return size


def _round_up(x, m):
    return ((x + m - 1) // m) * m


# ----------------------------------------------------------------------------- static plan
def _make_plan(H, W, K, num_cnn, chans, B):
    """Per-layer geometry for the (row = h*B + b, lane = w*C + c) layout.

    Rows live on a 'stretched' grid whose stride `hs` doubles after every pool; lanes
    are re-densified by every conv (the banded weight absorbs the post-pool lane
    stride ws=2), so lane stretching never accumulates.
    """
    layers = []
    H_l, W_l = H, W
    hs, ws = 1, 1
    LW = W * chans[0]          # lane extent of the current activation slab
    LH_rows = H * B            # row extent of the current activation slab
    for l in range(num_cnn):
        C_in, C_out = chans[l], chans[l + 1]
        convH, convW = H_l - K + 1, W_l - K + 1
        assert convH >= 2 and convW >= 2, "image too small for this conv stack"
        assert ws * (W_l - 1) * C_in + C_in <= LW
        Lrows_conv = (hs * (convH - 1) + 1) * B
        conv_offs = tuple(hs * kh * B for kh in range(K))         # 8-aligned (B % 8 == 0)
        assert conv_offs[-1] + Lrows_conv <= LH_rows
        out_lanes = convW * C_out
        poolH, poolW = convH // 2, convW // 2
        assert poolH >= 1 and poolW >= 1
        Lrows_m = Lrows_conv - hs * B
        m_lanes = out_lanes - C_out
        layers.append(dict(C_in=C_in, C_out=C_out, convW=convW, LW=LW, ws=ws,
                           Lrows_conv=Lrows_conv, conv_offs=conv_offs,
                           out_lanes=out_lanes, Lrows_m=Lrows_m, m_lanes=m_lanes,
                           pool_row_off=hs * B, pool_lane_off=C_out))
        hs *= 2
        ws = 2
        H_l, W_l = poolH, poolW
        LW, LH_rows = m_lanes, Lrows_m
    return dict(layers=layers, sH=H_l, sW=W_l, hs_F=hs, ws_F=ws,
                LW_F=LW, LH_rows_F=LH_rows)


def _banded_conv_weight(w_oihw, K, C_in, C_out, LW, ws, convW, dtype):
    """Dense (K*LW, convW*C_out) matrix for the im2col-over-kh matmul.

    Nonzero at [kh*LW + ws*(w_out+kw)*C_in + ci, w_out*C_out + co] = W[co, ci, kh, kw];
    zeros elsewhere absorb both the kw taps and the lane decimation of the previous
    pool stage (ws == 2 for all layers after the first).
    """
    kh, kw, wo, ci, co = np.meshgrid(np.arange(K), np.arange(K), np.arange(convW),
                                     np.arange(C_in), np.arange(C_out), indexing="ij")
    rows = (kh * LW + ws * (wo + kw) * C_in + ci).ravel()
    cols = (wo * C_out + co).ravel()
    vals = w_oihw[co.ravel(), ci.ravel(), kh.ravel(), kw.ravel()].astype(dtype)
    return jnp.zeros((K * LW, convW * C_out), dtype).at[rows, cols].set(vals)


def _folded_mlp0_weight(W1, sH, sW, C_F, LW_F, ws_F, hid0, dtype):
    """Per-spatial-row slabs of the first Linear layer with the NCHW flatten folded in.

    Wm0[hq, ws_F*wq*C_F + c, j] = W1[j, c*sH*sW + hq*sW + wq]; zeros elsewhere.
    """
    hq, wq, c, j = np.meshgrid(np.arange(sH), np.arange(sW), np.arange(C_F),
                               np.arange(hid0), indexing="ij")
    lanes = (ws_F * wq * C_F + c).ravel()
    feats = (c * sH * sW + hq * sW + wq).ravel()
    vals = W1[j.ravel(), feats].astype(dtype)
    return jnp.zeros((sH, LW_F, hid0), dtype).at[hq.ravel(), lanes, j.ravel()].set(vals)


# ----------------------------------------------------------------------------- fused forward
def cnn_mlp_forward(x, conv_params_oihw, mlp_params_torch, act_hidden, act_last,
                    *, block_images=None, compute_dtype=jnp.float32):
    """x: (num_traj, num_obs, C, H, W) -- identical to the PyTorch module's input."""
    T, O = x.shape[:2]
    Cin, H, W = int(x.shape[2]), int(x.shape[3]), int(x.shape[4])
    N = T * O
    num_cnn = len(conv_params_oihw)
    K = int(conv_params_oihw[0][0].shape[-1])
    chans = [Cin] + [int(w.shape[0]) for (w, _) in conv_params_oihw]

    # Images per grid block (multiple of 8 so every row offset stays sublane-aligned).
    if block_images is None:
        B = min(256, _round_up(N, 8))
    else:
        B = _round_up(max(int(block_images), 8), 8)
    G = int(pl.cdiv(N, B))
    Np = G * B

    plan = _make_plan(H, W, K, num_cnn, chans, B)
    layers = plan["layers"]
    sH, sW, C_F = plan["sH"], plan["sW"], chans[-1]
    LW_F, hs_F, ws_F = plan["LW_F"], plan["hs_F"], plan["ws_F"]

    # ---------------- parameters (packed once, lane-dense) ----------------
    conv_wb, conv_bt = [], []
    for l, (w_oihw, b) in enumerate(conv_params_oihw):
        L = layers[l]
        conv_wb.append(_banded_conv_weight(w_oihw, K, L["C_in"], L["C_out"],
                                           L["LW"], L["ws"], L["convW"], compute_dtype))
        conv_bt.append(jnp.tile(b.astype(jnp.float32), (L["convW"],)).reshape(1, L["out_lanes"]))

    W1, b1 = mlp_params_torch[0]
    hid0 = int(W1.shape[0])
    assert int(W1.shape[1]) == C_F * sH * sW, "MLP dim_in mismatch"
    mw0 = _folded_mlp0_weight(W1, sH, sW, C_F, LW_F, ws_F, hid0, compute_dtype)
    mb0 = b1.reshape(1, hid0).astype(jnp.float32)
    tail_w = [jnp.asarray(w, compute_dtype).T for (w, _) in mlp_params_torch[1:]]   # (in,out)
    tail_b = [b.reshape(1, -1).astype(jnp.float32) for (_, b) in mlp_params_torch[1:]]
    n_tail = len(tail_w)
    dim_out = int(mlp_params_torch[-1][0].shape[0])

    # ---------------- input packing: (G blocks) x (row = h*B + b) x (lane = w*Cin + c)
    d = jnp.transpose(x.reshape(N, Cin, H, W), (0, 2, 3, 1)).reshape(N, H, W * Cin)
    d = d.astype(compute_dtype)
    if Np > N:
        d = jnp.pad(d, ((0, Np - N), (0, 0), (0, 0)))
    d = jnp.transpose(d.reshape(G, B, H, W * Cin), (0, 2, 1, 3)).reshape(G * H * B, W * Cin)

    weight_inputs = []
    for l in range(num_cnn):
        weight_inputs += [conv_wb[l], conv_bt[l]]
    weight_inputs += [mw0, mb0]
    for li in range(n_tail):
        weight_inputs += [tail_w[li], tail_b[li]]

    # ---------------- kernel ----------------
    def kernel(*refs):
        i = 0
        x_ref = refs[i]; i += 1
        cwr, cbr = [], []
        for _ in range(num_cnn):
            cwr.append(refs[i]); cbr.append(refs[i + 1]); i += 2
        mw0_ref, mb0_ref = refs[i], refs[i + 1]; i += 2
        twr, tbr = [], []
        for _ in range(n_tail):
            twr.append(refs[i]); tbr.append(refs[i + 1]); i += 2
        o_ref = refs[i]; i += 1
        scratch = refs[i:]

        src = x_ref
        for l, L in enumerate(layers):
            c_scr, a_scr = scratch[2 * l], scratch[2 * l + 1]
            # im2col over kh: K row-aligned slices concatenated on lanes -> ONE fat dot.
            im2col = jnp.concatenate(
                [src[pl.ds(off, L["Lrows_conv"]), :] for off in L["conv_offs"]], axis=1)
            c_scr[...] = jnp.dot(im2col, cwr[l][...],
                                 preferred_element_type=jnp.float32) + cbr[l][...]
            # 2x2 max-pool: 4 shifted maxima on the VPU.  The stride-2 decimation is
            # never materialized (rows: folded into the next layer's row-grid stride;
            # lanes: folded into the next layer's banded weight).
            rr, lo = L["pool_row_off"], L["pool_lane_off"]
            Lm, ml = L["Lrows_m"], L["m_lanes"]
            m = jnp.maximum(c_scr[pl.ds(0, Lm), pl.ds(0, ml)],
                            c_scr[pl.ds(0, Lm), pl.ds(lo, ml)])
            m = jnp.maximum(m, jnp.maximum(c_scr[pl.ds(rr, Lm), pl.ds(0, ml)],
                                           c_scr[pl.ds(rr, Lm), pl.ds(lo, ml)]))
            a_scr[...] = act_hidden(m).astype(a_scr.dtype)
            src = a_scr

        # MLP layer 0: only the B real image rows are read (aligned contiguous slices,
        # one per pooled spatial row); the torch NCHW flatten lives inside mw0.
        z = None
        for hq in range(sH):
            part = jnp.dot(src[pl.ds(hs_F * hq * B, B), :], mw0_ref[hq],
                           preferred_element_type=jnp.float32)
            z = part if z is None else z + part
        h = act_hidden(z + mb0_ref[...])

        # Remaining MLP layers.
        for li in range(n_tail):
            h = jnp.dot(h.astype(compute_dtype), twr[li][...],
                        preferred_element_type=jnp.float32) + tbr[li][...]
            if li < n_tail - 1:
                h = act_hidden(h)
            elif act_last is not None:
                h = act_last(h)
        o_ref[...] = h.astype(o_ref.dtype)

    # ---------------- specs / scratch / VMEM budget ----------------
    in_specs = [pl.BlockSpec((H * B, W * Cin), lambda g: (g, 0))]
    in_specs += [pl.BlockSpec(memory_space=pltpu.MemorySpace.VMEM)] * len(weight_inputs)
    out_specs = pl.BlockSpec((B, dim_out), lambda g: (g, 0))

    scratch_shapes = []
    for L in layers:
        scratch_shapes += [pltpu.VMEM((L["Lrows_conv"], L["out_lanes"]), jnp.float32),
                           pltpu.VMEM((L["Lrows_m"], L["m_lanes"]), compute_dtype)]

    def _padded_bytes(shape, itemsize):
        rows = int(np.prod(shape[:-1])) if len(shape) > 1 else 1
        return _round_up(max(rows, 1), 8) * _round_up(int(shape[-1]), 128) * itemsize

    item = jnp.dtype(compute_dtype).itemsize
    est = 2 * _padded_bytes((H * B, W * Cin), item)          # double-buffered input block
    est += 2 * _padded_bytes((B, dim_out), 4)                # double-buffered output block
    for w in weight_inputs:
        est += _padded_bytes(w.shape, jnp.dtype(w.dtype).itemsize)
    for L in layers:
        est += _padded_bytes((L["Lrows_conv"], L["out_lanes"]), 4)
        est += _padded_bytes((L["Lrows_m"], L["m_lanes"]), item)
    est += 2 * 1024 * 1024                                   # compiler temporaries slack
    try:
        vmem_cap = int(pltpu.get_tpu_info().vmem_capacity_bytes)
    except Exception:
        vmem_cap = 64 * 1024 * 1024
    vmem_limit = int(min(max(est, 16 * 1024 * 1024), int(0.75 * vmem_cap)))

    out2d = pl.pallas_call(
        kernel,
        out_shape=jax.ShapeDtypeStruct((G * B, dim_out), jnp.float32),
        grid=(G,),
        in_specs=in_specs,
        out_specs=out_specs,
        scratch_shapes=scratch_shapes,
        compiler_params=pltpu.CompilerParams(
            dimension_semantics=("parallel",),
            vmem_limit_bytes=vmem_limit),
    )(d, *weight_inputs)
    return out2d[:N].reshape(T, O, dim_out)


# ----------------------------------------------------------------------------- pure-JAX reference
def reference_forward(x, conv_params_oihw, mlp_params_torch, act_hidden, act_last):
    T, O = x.shape[:2]
    d = x.reshape((-1,) + x.shape[2:])
    for (w, b) in conv_params_oihw:
        d = lax.conv_general_dilated(
            d, w, window_strides=(1, 1), padding="VALID",
            dimension_numbers=("NCHW", "OIHW", "NCHW"),
            precision=lax.Precision.HIGHEST) + b[None, :, None, None]
        d = lax.reduce_window(d, -jnp.inf, lax.max, (1, 1, 2, 2), (1, 1, 2, 2), "VALID")
        d = act_hidden(d)
    d = d.reshape(T, O, -1)
    num_layers = len(mlp_params_torch)
    for li, (w, b) in enumerate(mlp_params_torch):
        d = jnp.dot(d, w.T, precision=lax.Precision.HIGHEST) + b
        if li < num_layers - 1:
            d = act_hidden(d)
        elif act_last is not None:
            d = act_last(d)
    return d


# ----------------------------------------------------------------------------- main
if __name__ == "__main__":
    # Module hyper-parameters (small, consistent with CNNMLP.__init__)
    image_size = [16, 16]
    kernel_size = 3
    num_cnn = 2
    cnn_channels = [4, 8, 8]           # num_cnn + 1 entries
    hidden_layers = [32, 32]
    dim_out = 10
    act_hidden = get_act_func("relu")
    act_last = get_act_func("tanh")

    num_traj, num_obs = 2, 3

    out_sizes = [image_output_size(s, num_cnn, kernel_size) for s in image_size]
    dim_in = cnn_channels[-1]
    for s in out_sizes:
        dim_in *= s                     # = 8 * 2 * 2 = 32

    # Deterministic parameter init (synthetic; torch layouts: conv OIHW, linear (out, in))
    key = jax.random.PRNGKey(0)
    conv_params = []
    cin = cnn_channels[0]
    for i in range(num_cnn):
        cout = cnn_channels[i + 1]
        key, kw, kb = jax.random.split(key, 3)
        w = jax.random.normal(kw, (cout, cin, kernel_size, kernel_size), jnp.float32) * 0.1
        b = jax.random.normal(kb, (cout,), jnp.float32) * 0.1
        conv_params.append((w, b))
        cin = cout

    dims = [dim_in] + hidden_layers + [dim_out]
    mlp_params = []
    for i in range(len(dims) - 1):
        key, kw, kb = jax.random.split(key, 3)
        w = jax.random.normal(kw, (dims[i + 1], dims[i]), jnp.float32) * 0.1
        b = jax.random.normal(kb, (dims[i + 1],), jnp.float32) * 0.1
        mlp_params.append((w, b))

    # Deterministic input (num_traj, num_obs, C, H, W)
    key, kx = jax.random.split(key)
    x = jax.random.normal(kx, (num_traj, num_obs, cnn_channels[0], *image_size), jnp.float32)

    fwd = jax.jit(functools.partial(cnn_mlp_forward,
                                    conv_params_oihw=conv_params,
                                    mlp_params_torch=mlp_params,
                                    act_hidden=act_hidden,
                                    act_last=act_last))
    out = fwd(x)
    out = jax.block_until_ready(out)

    ref = reference_forward(x, conv_params, mlp_params, act_hidden, act_last)
    ref = jax.block_until_ready(ref)

    assert out.shape == (num_traj, num_obs, dim_out), out.shape
    np.testing.assert_allclose(np.asarray(out), np.asarray(ref), atol=1e-3, rtol=1e-3)

    print("KERNEL_OK")
</pallas_src>

<mosaic_0001>
module attributes {stable_mosaic.version = 11 : i64} {
  func.func @kernel(%arg0: i32, %arg1: memref<128x64xf32, #tpu.memory_space<vmem>>, %arg2: memref<192x112xf32, #tpu.memory_space<vmem>>, %arg3: memref<1x112xf32, #tpu.memory_space<vmem>>, %arg4: memref<312x40xf32, #tpu.memory_space<vmem>>, %arg5: memref<1x40xf32, #tpu.memory_space<vmem>>, %arg6: memref<2x32x32xf32, #tpu.memory_space<vmem>>, %arg7: memref<1x32xf32, #tpu.memory_space<vmem>>, %arg8: memref<32x32xf32, #tpu.memory_space<vmem>>, %arg9: memref<1x32xf32, #tpu.memory_space<vmem>>, %arg10: memref<32x10xf32, #tpu.memory_space<vmem>>, %arg11: memref<1x10xf32, #tpu.memory_space<vmem>>, %arg12: memref<8x10xf32, #tpu.memory_space<vmem>>, %arg13: memref<112x112xf32, #tpu.memory_space<vmem>>, %arg14: memref<104x104xf32, #tpu.memory_space<vmem>>, %arg15: memref<72x40xf32, #tpu.memory_space<vmem>>, %arg16: memref<56x32xf32, #tpu.memory_space<vmem>>) attributes {dimension_semantics = [#tpu.dimension_semantics<parallel>], iteration_bounds = array<i64: 1>, scalar_prefetch = 0 : i64, scratch_operands = 4 : i64, tpu.core_type = #tpu.core_type<tc>, window_params = [{transform_indices = @transform_0, window_bounds = array<i64: 128, 64>}, {pipeline_mode = #tpu.pipeline_mode<synchronous>, transform_indices = @transform_1, window_bounds = array<i64: 192, 112>}, {pipeline_mode = #tpu.pipeline_mode<synchronous>, transform_indices = @transform_2, window_bounds = array<i64: 1, 112>}, {pipeline_mode = #tpu.pipeline_mode<synchronous>, transform_indices = @transform_3, window_bounds = array<i64: 312, 40>}, {pipeline_mode = #tpu.pipeline_mode<synchronous>, transform_indices = @transform_4, window_bounds = array<i64: 1, 40>}, {pipeline_mode = #tpu.pipeline_mode<synchronous>, transform_indices = @transform_5, window_bounds = array<i64: 2, 32, 32>}, {pipeline_mode = #tpu.pipeline_mode<synchronous>, transform_indices = @transform_6, window_bounds = array<i64: 1, 32>}, {pipeline_mode = #tpu.pipeline_mode<synchronous>, transform_indices = @transform_7, window_bounds = array<i64: 32, 32>}, {pipeline_mode = #tpu.pipeline_mode<synchronous>, transform_indices = @transform_8, window_bounds = array<i64: 1, 32>}, {pipeline_mode = #tpu.pipeline_mode<synchronous>, transform_indices = @transform_9, window_bounds = array<i64: 32, 10>}, {pipeline_mode = #tpu.pipeline_mode<synchronous>, transform_indices = @transform_10, window_bounds = array<i64: 1, 10>}, {transform_indices = @transform_11, window_bounds = array<i64: 8, 10>}]} {
    %c0 = arith.constant 0 : index
    %c0_0 = arith.constant 0 : index
    %0 = vector.load %arg1[%c0, %c0_0] : memref<128x64xf32, #tpu.memory_space<vmem>>, vector<112x64xf32>
    %c8 = arith.constant 8 : index
    %c0_1 = arith.constant 0 : index
    %1 = vector.load %arg1[%c8, %c0_1] : memref<128x64xf32, #tpu.memory_space<vmem>>, vector<112x64xf32>
    %c16 = arith.constant 16 : index
    %c0_2 = arith.constant 0 : index
    %2 = vector.load %arg1[%c16, %c0_2] : memref<128x64xf32, #tpu.memory_space<vmem>>, vector<112x64xf32>
    %3 = tpu.concatenate %0, %1, %2 in 1 : vector<112x64xf32>, vector<112x64xf32>, vector<112x64xf32> -> vector<112x192xf32>
    %c0_3 = arith.constant 0 : index
    %c0_4 = arith.constant 0 : index
    %4 = vector.load %arg2[%c0_3, %c0_4] : memref<192x112xf32, #tpu.memory_space<vmem>>, vector<192x112xf32>
    %cst = arith.constant dense<0.000000e+00> : vector<112x112xf32>
    %5 = tpu.matmul %3, %4, %cst {dimension_numbers = #tpu.dot_dimension_numbers<[1], [0], [0], [1], [0, 0, 1, 1], [], []>} : vector<112x192xf32>, vector<192x112xf32>, vector<112x112xf32> -> vector<112x112xf32>
    %c0_5 = arith.constant 0 : index
    %c0_6 = arith.constant 0 : index
    %6 = vector.load %arg3[%c0_5, %c0_6] : memref<1x112xf32, #tpu.memory_space<vmem>>, vector<1x112xf32>
    %7 = vector.broadcast %6 : vector<1x112xf32> to vector<112x112xf32>
    %8 = arith.addf %5, %7 : vector<112x112xf32>
    %c0_7 = arith.constant 0 : index
    %c0_8 = arith.constant 0 : index
    %9 = vector.load %arg13[%c0_7, %c0_8] : memref<112x112xf32, #tpu.memory_space<vmem>>, vector<112x112xf32>
    tpu.vector_store %arg13[%c0_7, %c0_8], %8 {strides = array<i32>} : memref<112x112xf32, #tpu.memory_space<vmem>>, vector<112x112xf32>,
    %c0_9 = arith.constant 0 : index
    %c0_10 = arith.constant 0 : index
    %10 = vector.load %arg13[%c0_9, %c0_10] : memref<112x112xf32, #tpu.memory_space<vmem>>, vector<104x104xf32>
    %c0_11 = arith.constant 0 : index
    %c8_12 = arith.constant 8 : index
    %11 = vector.load %arg13[%c0_11, %c8_12] : memref<112x112xf32, #tpu.memory_space<vmem>>, vector<104x104xf32>
    %12 = arith.maximumf %10, %11 : vector<104x104xf32>
    %c8_13 = arith.constant 8 : index
    %c0_14 = arith.constant 0 : index
    %13 = vector.load %arg13[%c8_13, %c0_14] : memref<112x112xf32, #tpu.memory_space<vmem>>, vector<104x104xf32>
    %c8_15 = arith.constant 8 : index
    %c8_16 = arith.constant 8 : index
    %14 = vector.load %arg13[%c8_15, %c8_16] : memref<112x112xf32, #tpu.memory_space<vmem>>, vector<104x104xf32>
    %15 = arith.maximumf %13, %14 : vector<104x104xf32>
    %16 = arith.maximumf %12, %15 : vector<104x104xf32>
    %cst_17 = arith.constant 0.000000e+00 : f32
    %17 = vector.broadcast %cst_17 : f32 to vector<104x104xf32>
    %18 = arith.maximumf %16, %17 : vector<104x104xf32>
    %c0_18 = arith.constant 0 : index
    %c0_19 = arith.constant 0 : index
    %19 = vector.load %arg14[%c0_18, %c0_19] : memref<104x104xf32, #tpu.memory_space<vmem>>, vector<104x104xf32>
    tpu.vector_store %arg14[%c0_18, %c0_19], %18 {strides = array<i32>} : memref<104x104xf32, #tpu.memory_space<vmem>>, vector<104x104xf32>,
    %c0_20 = arith.constant 0 : index
    %c0_21 = arith.constant 0 : index
    %20 = vector.load %arg14[%c0_20, %c0_21] : memref<104x104xf32, #tpu.memory_space<vmem>>, vector<72x104xf32>
    %c16_22 = arith.constant 16 : index
    %c0_23 = arith.constant 0 : index
    %21 = vector.load %arg14[%c16_22, %c0_23] : memref<104x104xf32, #tpu.memory_space<vmem>>, vector<72x104xf32>
    %c32 = arith.constant 32 : index
    %c0_24 = arith.constant 0 : index
    %22 = vector.load %arg14[%c32, %c0_24] : memref<104x104xf32, #tpu.memory_space<vmem>>, vector<72x104xf32>
    %23 = tpu.concatenate %20, %21, %22 in 1 : vector<72x104xf32>, vector<72x104xf32>, vector<72x104xf32> -> vector<72x312xf32>
    %c0_25 = arith.constant 0 : index
    %c0_26 = arith.constant 0 : index
    %24 = vector.load %arg4[%c0_25, %c0_26] : memref<312x40xf32, #tpu.memory_space<vmem>>, vector<312x40xf32>
    %cst_27 = arith.constant dense<0.000000e+00> : vector<72x40xf32>
    %25 = tpu.matmul %23, %24, %cst_27 {dimension_numbers = #tpu.dot_dimension_numbers<[1], [0], [0], [1], [0, 0, 1, 1], [], []>} : vector<72x312xf32>, vector<312x40xf32>, vector<72x40xf32> -> vector<72x40xf32>
    %c0_28 = arith.constant 0 : index
    %c0_29 = arith.constant 0 : index
    %26 = vector.load %arg5[%c0_28, %c0_29] : memref<1x40xf32, #tpu.memory_space<vmem>>, vector<1x40xf32>
    %27 = vector.broadcast %26 : vector<1x40xf32> to vector<72x40xf32>
    %28 = arith.addf %25, %27 : vector<72x40xf32>
    %c0_30 = arith.constant 0 : index
    %c0_31 = arith.constant 0 : index
    %29 = vector.load %arg15[%c0_30, %c0_31] : memref<72x40xf32, #tpu.memory_space<vmem>>, vector<72x40xf32>
    tpu.vector_store %arg15[%c0_30, %c0_31], %28 {strides = array<i32>} : memref<72x40xf32, #tpu.memory_space<vmem>>, vector<72x40xf32>,
    %c0_32 = arith.constant 0 : index
    %c0_33 = arith.constant 0 : index
    %30 = vector.load %arg15[%c0_32, %c0_33] : memref<72x40xf32, #tpu.memory_space<vmem>>, vector<56x32xf32>
    %c0_34 = arith.constant 0 : index
    %c8_35 = arith.constant 8 : index
    %31 = vector.load %arg15[%c0_34, %c8_35] : memref<72x40xf32, #tpu.memory_space<vmem>>, vector<56x32xf32>
    %32 = arith.maximumf %30, %31 : vector<56x32xf32>
    %c16_36 = arith.constant 16 : index
    %c0_37 = arith.constant 0 : index
    %33 = vector.load %arg15[%c16_36, %c0_37] : memref<72x40xf32, #tpu.memory_space<vmem>>, vector<56x32xf32>
    %c16_38 = arith.constant 16 : index
    %c8_39 = arith.constant 8 : index
    %34 = vector.load %arg15[%c16_38, %c8_39] : memref<72x40xf32, #tpu.memory_space<vmem>>, vector<56x32xf32>
    %35 = arith.maximumf %33, %34 : vector<56x32xf32>
    %36 = arith.maximumf %32, %35 : vector<56x32xf32>
    %cst_40 = arith.constant 0.000000e+00 : f32
    %37 = vector.broadcast %cst_40 : f32 to vector<56x32xf32>
    %38 = arith.maximumf %36, %37 : vector<56x32xf32>
    %c0_41 = arith.constant 0 : index
    %c0_42 = arith.constant 0 : index
    %39 = vector.load %arg16[%c0_41, %c0_42] : memref<56x32xf32, #tpu.memory_space<vmem>>, vector<56x32xf32>
    tpu.vector_store %arg16[%c0_41, %c0_42], %38 {strides = array<i32>} : memref<56x32xf32, #tpu.memory_space<vmem>>, vector<56x32xf32>,
    %c0_43 = arith.constant 0 : index
    %c0_44 = arith.constant 0 : index
    %40 = vector.load %arg16[%c0_43, %c0_44] : memref<56x32xf32, #tpu.memory_space<vmem>>, vector<8x32xf32>
    %c0_45 = arith.constant 0 : index
    %c0_46 = arith.constant 0 : index
    %c0_47 = arith.constant 0 : index
    %41 = vector.load %arg6[%c0_45, %c0_46, %c0_47] : memref<2x32x32xf32, #tpu.memory_space<vmem>>, vector<1x32x32xf32>
    %42 = vector.shape_cast %41 : vector<1x32x32xf32> to vector<32x32xf32>
    %cst_48 = arith.constant dense<0.000000e+00> : vector<8x32xf32>
    %43 = tpu.matmul %40, %42, %cst_48 {dimension_numbers = #tpu.dot_dimension_numbers<[1], [0], [0], [1], [0, 0, 1, 1], [], []>} : vector<8x32xf32>, vector<32x32xf32>, vector<8x32xf32> -> vector<8x32xf32>
    %c32_49 = arith.constant 32 : index
    %c0_50 = arith.constant 0 : index
    %44 = vector.load %arg16[%c32_49, %c0_50] : memref<56x32xf32, #tpu.memory_space<vmem>>, vector<8x32xf32>
    %c1 = arith.constant 1 : index
    %c0_51 = arith.constant 0 : index
    %c0_52 = arith.constant 0 : index
    %45 = vector.load %arg6[%c1, %c0_51, %c0_52] : memref<2x32x32xf32, #tpu.memory_space<vmem>>, vector<1x32x32xf32>
    %46 = vector.shape_cast %45 : vector<1x32x32xf32> to vector<32x32xf32>
    %cst_53 = arith.constant dense<0.000000e+00> : vector<8x32xf32>
    %47 = tpu.matmul %44, %46, %cst_53 {dimension_numbers = #tpu.dot_dimension_numbers<[1], [0], [0], [1], [0, 0, 1, 1], [], []>} : vector<8x32xf32>, vector<32x32xf32>, vector<8x32xf32> -> vector<8x32xf32>
    %48 = arith.addf %43, %47 : vector<8x32xf32>
    %c0_54 = arith.constant 0 : index
    %c0_55 = arith.constant 0 : index
    %49 = vector.load %arg7[%c0_54, %c0_55] : memref<1x32xf32, #tpu.memory_space<vmem>>, vector<1x32xf32>
    %50 = vector.broadcast %49 : vector<1x32xf32> to vector<8x32xf32>
    %51 = arith.addf %48, %50 : vector<8x32xf32>
    %cst_56 = arith.constant 0.000000e+00 : f32
    %52 = vector.broadcast %cst_56 : f32 to vector<8x32xf32>
    %53 = arith.maximumf %51, %52 : vector<8x32xf32>
    %c0_57 = arith.constant 0 : index
    %c0_58 = arith.constant 0 : index
    %54 = vector.load %arg8[%c0_57, %c0_58] : memref<32x32xf32, #tpu.memory_space<vmem>>, vector<32x32xf32>
    %cst_59 = arith.constant dense<0.000000e+00> : vector<8x32xf32>
    %55 = tpu.matmul %53, %54, %cst_59 {dimension_numbers = #tpu.dot_dimension_numbers<[1], [0], [0], [1], [0, 0, 1, 1], [], []>} : vector<8x32xf32>, vector<32x32xf32>, vector<8x32xf32> -> vector<8x32xf32>
    %c0_60 = arith.constant 0 : index
    %c0_61 = arith.constant 0 : index
    %56 = vector.load %arg9[%c0_60, %c0_61] : memref<1x32xf32, #tpu.memory_space<vmem>>, vector<1x32xf32>
    %57 = vector.broadcast %56 : vector<1x32xf32> to vector<8x32xf32>
    %58 = arith.addf %55, %57 : vector<8x32xf32>
    %cst_62 = arith.constant 0.000000e+00 : f32
    %59 = vector.broadcast %cst_62 : f32 to vector<8x32xf32>
    %60 = arith.maximumf %58, %59 : vector<8x32xf32>
    %c0_63 = arith.constant 0 : index
    %c0_64 = arith.constant 0 : index
    %61 = vector.load %arg10[%c0_63, %c0_64] : memref<32x10xf32, #tpu.memory_space<vmem>>, vector<32x10xf32>
    %cst_65 = arith.constant dense<0.000000e+00> : vector<8x10xf32>
    %62 = tpu.matmul %60, %61, %cst_65 {dimension_numbers = #tpu.dot_dimension_numbers<[1], [0], [0], [1], [0, 0, 1, 1], [], []>} : vector<8x32xf32>, vector<32x10xf32>, vector<8x10xf32> -> vector<8x10xf32>
    %c0_66 = arith.constant 0 : index
    %c0_67 = arith.constant 0 : index
    %63 = vector.load %arg11[%c0_66, %c0_67] : memref<1x10xf32, #tpu.memory_space<vmem>>, vector<1x10xf32>
    %64 = vector.broadcast %63 : vector<1x10xf32> to vector<8x10xf32>
    %65 = arith.addf %62, %64 : vector<8x10xf32>
    %66 = math.tanh %65 : vector<8x10xf32>
    %c0_68 = arith.constant 0 : index
    %c0_69 = arith.constant 0 : index
    %67 = vector.load %arg12[%c0_68, %c0_69] : memref<8x10xf32, #tpu.memory_space<vmem>>, vector<8x10xf32>
    tpu.vector_store %arg12[%c0_68, %c0_69], %66 {strides = array<i32>} : memref<8x10xf32, #tpu.memory_space<vmem>>, vector<8x10xf32>,
    return
  }
  func.func @transform_0(%arg0: i32) -> (i32, i32) {
    %c0_i32 = arith.constant 0 : i32
    %c0_i32_0 = arith.constant 0 : i32
    return %arg0, %c0_i32 : i32, i32
  }
  func.func @transform_1(%arg0: i32) -> (i32, i32) {
    %c0_i32 = arith.constant 0 : i32
    %c0_i32_0 = arith.constant 0 : i32
    %c0_i32_1 = arith.constant 0 : i32
    return %c0_i32, %c0_i32_0 : i32, i32
  }
  func.func @transform_2(%arg0: i32) -> (i32, i32) {
    %c0_i32 = arith.constant 0 : i32
    %c0_i32_0 = arith.constant 0 : i32
    %c0_i32_1 = arith.constant 0 : i32
    return %c0_i32, %c0_i32_0 : i32, i32
  }
  func.func @transform_3(%arg0: i32) -> (i32, i32) {
    %c0_i32 = arith.constant 0 : i32
    %c0_i32_0 = arith.constant 0 : i32
    %c0_i32_1 = arith.constant 0 : i32
    return %c0_i32, %c0_i32_0 : i32, i32
  }
  func.func @transform_4(%arg0: i32) -> (i32, i32) {
    %c0_i32 = arith.constant 0 : i32
    %c0_i32_0 = arith.constant 0 : i32
    %c0_i32_1 = arith.constant 0 : i32
    return %c0_i32, %c0_i32_0 : i32, i32
  }
  func.func @transform_5(%arg0: i32) -> (i32, i32, i32) {
    %c0_i32 = arith.constant 0 : i32
    %c0_i32_0 = arith.constant 0 : i32
    %c0_i32_1 = arith.constant 0 : i32
    %c0_i32_2 = arith.constant 0 : i32
    return %c0_i32, %c0_i32_0, %c0_i32_1 : i32, i32, i32
  }
  func.func @transform_6(%arg0: i32) -> (i32, i32) {
    %c0_i32 = arith.constant 0 : i32
    %c0_i32_0 = arith.constant 0 : i32
    %c0_i32_1 = arith.constant 0 : i32
    return %c0_i32, %c0_i32_0 : i32, i32
  }
  func.func @transform_7(%arg0: i32) -> (i32, i32) {
    %c0_i32 = arith.constant 0 : i32
    %c0_i32_0 = arith.constant 0 : i32
    %c0_i32_1 = arith.constant 0 : i32
    return %c0_i32, %c0_i32_0 : i32, i32
  }
  func.func @transform_8(%arg0: i32) -> (i32, i32) {
    %c0_i32 = arith.constant 0 : i32
    %c0_i32_0 = arith.constant 0 : i32
    %c0_i32_1 = arith.constant 0 : i32
    return %c0_i32, %c0_i32_0 : i32, i32
  }
  func.func @transform_9(%arg0: i32) -> (i32, i32) {
    %c0_i32 = arith.constant 0 : i32
    %c0_i32_0 = arith.constant 0 : i32
    %c0_i32_1 = arith.constant 0 : i32
    return %c0_i32, %c0_i32_0 : i32, i32
  }
  func.func @transform_10(%arg0: i32) -> (i32, i32) {
    %c0_i32 = arith.constant 0 : i32
    %c0_i32_0 = arith.constant 0 : i32
    %c0_i32_1 = arith.constant 0 : i32
    return %c0_i32, %c0_i32_0 : i32, i32
  }
  func.func @transform_11(%arg0: i32) -> (i32, i32) {
    %c0_i32 = arith.constant 0 : i32
    %c0_i32_0 = arith.constant 0 : i32
    return %arg0, %c0_i32 : i32, i32
  }
}

</mosaic_0001>

<bundles_post_ra>
// kernel: tile.10
= control target key start
LH: loop header
LB: loop body
LE: loop exit
PB: predicated region body
PF: predicated region fallthrough
CT: control target
= control target key end

     0   :  { %s28_s0 = inlined_call_operand.vmem [shape: f32[8], index: 0, kind: input, shape index: {}]   ;;  %s29_s1 = inlined_call_operand.vmem [shape: f32[14,8], index: 1, kind: output, shape index: {}]  }
   0x1   :  { %v4_v0 = vld [vmem:[%s28_s0] ss:$0 sm:$0xff] }
   0x2   :  { %5 = vst [vmem:[%s29_s1] sm:$0xff] %v4_v0  ;;  %8 = vst [vmem:[%s29_s1 + $0x8] sm:$0xff] %v4_v0 }

// kernel: tile.14
= control target key start
LH: loop header
LB: loop body
LE: loop exit
PB: predicated region body
PF: predicated region fallthrough
CT: control target
= control target key end

     0   :  { %s22_s0 = inlined_call_operand.vmem [shape: f32[8], index: 0, kind: input, shape index: {}]   ;;  %s23_s1 = inlined_call_operand.vmem [shape: f32[5,8], index: 1, kind: output, shape index: {}]  }
   0x1   :  { %v4_v0 = vld [vmem:[%s22_s0] ss:$0 sm:$0xff] }
   0x2   :  { %5 = vst [vmem:[%s23_s1] sm:$0xff] %v4_v0 }

// kernel: tile.11
= control target key start
LH: loop header
LB: loop body
LE: loop exit
PB: predicated region body
PF: predicated region fallthrough
CT: control target
= control target key end

     0   :  { %s115_s10 = smov 104   ;;  %s116_s11 = smov 88   ;;  %vm3_vm0 = vcmask 64512   ;;  %vm9_vm1 = vcmask 917312   ;;  %vm15_vm2 = vcmask 851712   ;;  %vm21_vm3 = vcmask 786112   ;;  %s183_s0 = inlined_call_operand.vmem [shape: f32[14,8], index: 0, kind: input, shape index: {}]   ;;  %s184_s1 = inlined_call_operand.vmem [shape: f32[1,112], index: 1, kind: output, shape index: {}]  }
   0x1   :  { %v89_v0 = vld [vmem:[%s183_s0 + $0xd] sm:$0x1]   ;;  %v91_v1 = vld [vmem:[%s183_s0 + $0xb] sm:$0x1]   ;;  %v90_v2 = vld [vmem:[%s183_s0 + $0xc] sm:$0x1]  }
   0x2   :  { %7 = vrot.lane.b32.xlu0 %v89_v0, %s115_s10  ;;  %19 = vrot.lane.b32.xlu1 %v91_v1, %s116_s11  ;;  %v92_v3 = vld [vmem:[%s183_s0 + $0xa] sm:$0x1]   ;;  %s117_s16 = smov 96   ;;  %s118_s17 = smov 80   ;;  %v93_v4 = vld [vmem:[%s183_s0 + $0x9] sm:$0x1]  }
   0x3   :  { %v94_v5 = vld [vmem:[%s183_s0 + $0x8] sm:$0x1]   ;;  %v2_v6 = vld [vmem:[%s183_s0] sm:$0x1]   ;;  %s119_s24 = smov 72   ;;  %s120_s25 = smov 64  }
   0x4   :  { %4 = vst.msk [vmem:[#allocation0] sm:$0x1] %vm3_vm0, %v2_v6   ;;  %v95_v7 = vld [vmem:[%s183_s0 + $0x7] sm:$0x1]   ;;  %v96_v8 = vld [vmem:[%s183_s0 + $0x6] sm:$0x1]  }
   0x5   :  { %s121_s30 = smov 56   ;;  %s122_s2 = smov 48   ;;  %v97_v9 = vld [vmem:[%s183_s0 + $0x5] sm:$0x1]   ;;  %v98_v10 = vld [vmem:[%s183_s0 + $0x4] sm:$0x1]  }
   0x6   :  { %13 = vrot.lane.b32.xlu0 %v90_v2, %s117_s16  ;;  %25 = vrot.lane.b32.xlu1 %v92_v3, %s118_s17  ;;  %s123_s7 = smov 40   ;;  %s124_s8 = smov 32   ;;  %v99_v11 = vld [vmem:[%s183_s0 + $0x3] sm:$0x1]   ;;  %v100_v12 = vld [vmem:[%s183_s0 + $0x2] sm:$0x1]  }
   0x7   :  { %s125_s13 = smov 24   ;;  %s126_s14 = smov 16   ;;  %v101_v13 = vld [vmem:[%s183_s0 + $0x1] sm:$0x1]   ;;  %vm27_vm4 = vcmask 720512   ;;  %vm33_vm5 = vcmask 654912  }
   0x8   :  { %s127_s0 = smov 8   ;;  %vm39_vm6 = vcmask 589312   ;;  %vm45_vm7 = vcmask 523712   ;;  %vm51_vm8 = vcmask 458112   ;;  %vm57_vm9 = vcmask 392512  }
   0x9   :  { %vm63_vm10 = vcmask 326912   ;;  %vm69_vm11 = vcmask 261312   ;;  %vm75_vm12 = vcmask 195712   ;;  %vm81_vm13 = vcmask 130112  }
   0xa   :  { %31 = vrot.lane.b32.xlu0 %v93_v4, %s119_s24  ;;  %37 = vrot.lane.b32.xlu1 %v94_v5, %s120_s25 }
   0xe   :  { %43 = vrot.lane.b32.xlu0 %v95_v7, %s121_s30  ;;  %49 = vrot.lane.b32.xlu1 %v96_v8, %s122_s2 }
  0x12   :  { %55 = vrot.lane.b32.xlu0 %v97_v9, %s123_s7  ;;  %61 = vrot.lane.b32.xlu1 %v98_v10, %s124_s8 }
  0x16   :  { %67 = vrot.lane.b32.xlu0 %v99_v11, %s125_s13  ;;  %73 = vrot.lane.b32.xlu1 %v100_v12, %s126_s14 }
  0x1a   :  { %79 = vrot.lane.b32.xlu0 %v101_v13, %s127_s0 }
  0x74   :  { %v8_v14 = vpop.permute.xlu0 %7   ;;  %v20_v15 = vpop.permute.xlu1 %19  }
  0x75   :  { %10 = vst.msk [vmem:[#allocation0] sm:$0x1] %vm9_vm1, %v8_v14  }
  0x78   :  { %v14_v16 = vpop.permute.xlu0 %13   ;;  %v26_v17 = vpop.permute.xlu1 %25  }
  0x79   :  { %16 = vst.msk [vmem:[#allocation0] sm:$0x1] %vm15_vm2, %v14_v16  }
  0x7a   :  { %22 = vst.msk [vmem:[#allocation0] sm:$0x1] %vm21_vm3, %v20_v15  }
  0x7b   :  { %28 = vst.msk [vmem:[#allocation0] sm:$0x1] %vm27_vm4, %v26_v17  }
  0x7c   :  { %v32_v18 = vpop.permute.xlu0 %31   ;;  %v38_v19 = vpop.permute.xlu1 %37  }
  0x7d   :  { %34 = vst.msk [vmem:[#allocation0] sm:$0x1] %vm33_vm5, %v32_v18  }
  0x7e   :  { %40 = vst.msk [vmem:[#allocation0] sm:$0x1] %vm39_vm6, %v38_v19  }
  0x80   :  { %v44_v20 = vpop.permute.xlu0 %43   ;;  %v50_v21 = vpop.permute.xlu1 %49  }
  0x81   :  { %46 = vst.msk [vmem:[#allocation0] sm:$0x1] %vm45_vm7, %v44_v20  }
  0x82   :  { %52 = vst.msk [vmem:[#allocation0] sm:$0x1] %vm51_vm8, %v50_v21  }
  0x84   :  { %v56_v22 = vpop.permute.xlu0 %55   ;;  %v62_v23 = vpop.permute.xlu1 %61  }
  0x85   :  { %58 = vst.msk [vmem:[#allocation0] sm:$0x1] %vm57_vm9, %v56_v22  }
  0x86   :  { %64 = vst.msk [vmem:[#allocation0] sm:$0x1] %vm63_vm10, %v62_v23  }
  0x88   :  { %v68_v24 = vpop.permute.xlu0 %67   ;;  %v74_v25 = vpop.permute.xlu1 %73  }
  0x89   :  { %70 = vst.msk [vmem:[#allocation0] sm:$0x1] %vm69_vm11, %v68_v24  }
  0x8a   :  { %76 = vst.msk [vmem:[#allocation0] sm:$0x1] %vm75_vm12, %v74_v25  }
  0x8c   :  { %v80_v26 = vpop.permute.xlu0 %79  }
  0x8d   :  { %82 = vst.msk [vmem:[#allocation0] sm:$0x1] %vm81_vm13, %v80_v26  }
  0x94   :  { %v86_v27 = vld [vmem:[#allocation0] sm:$0x1] }
  0x95   :  { %88 = vst [vmem:[%s184_s1] sm:$0x1] %v86_v27 }

// kernel: tile.15
= control target key start
LH: loop header
LB: loop body
LE: loop exit
PB: predicated region body
PF: predicated region fallthrough
CT: control target
= control target key end

     0   :  { %s43_s10 = smov 32   ;;  %s44_s11 = smov 16   ;;  %vm3_vm0 = vcmask 64512   ;;  %vm9_vm1 = vcmask 326912   ;;  %vm15_vm2 = vcmask 261312   ;;  %vm21_vm3 = vcmask 195712   ;;  %s75_s0 = inlined_call_operand.vmem [shape: f32[5,8], index: 0, kind: input, shape index: {}]   ;;  %s76_s1 = inlined_call_operand.vmem [shape: f32[1,40], index: 1, kind: output, shape index: {}]  }
   0x1   :  { %v35_v0 = vld [vmem:[%s75_s0 + $0x4] sm:$0x1]   ;;  %v37_v1 = vld [vmem:[%s75_s0 + $0x2] sm:$0x1]   ;;  %v36_v2 = vld [vmem:[%s75_s0 + $0x3] sm:$0x1]  }
   0x2   :  { %7 = vrot.lane.b32.xlu0 %v35_v0, %s43_s10  ;;  %19 = vrot.lane.b32.xlu1 %v37_v1, %s44_s11  ;;  %v38_v3 = vld [vmem:[%s75_s0 + $0x1] sm:$0x1]   ;;  %v2_v4 = vld [vmem:[%s75_s0] sm:$0x1]   ;;  %s45_s0 = smov 24   ;;  %s46_s18 = smov 8  }
   0x3   :  { %4 = vst.msk [vmem:[#allocation0] sm:$0x1] %vm3_vm0, %v2_v4   ;;  %vm27_vm4 = vcmask 130112  }
   0x6   :  { %13 = vrot.lane.b32.xlu0 %v36_v2, %s45_s0  ;;  %25 = vrot.lane.b32.xlu1 %v38_v3, %s46_s18 }
  0x74   :  { %v8_v5 = vpop.permute.xlu0 %7   ;;  %v20_v6 = vpop.permute.xlu1 %19  }
  0x75   :  { %10 = vst.msk [vmem:[#allocation0] sm:$0x1] %vm9_vm1, %v8_v5  }
  0x78   :  { %v14_v7 = vpop.permute.xlu0 %13   ;;  %v26_v8 = vpop.permute.xlu1 %25  }
  0x79   :  { %16 = vst.msk [vmem:[#allocation0] sm:$0x1] %vm15_vm2, %v14_v7  }
  0x7a   :  { %22 = vst.msk [vmem:[#allocation0] sm:$0x1] %vm21_vm3, %v20_v6  }
  0x7b   :  { %28 = vst.msk [vmem:[#allocation0] sm:$0x1] %vm27_vm4, %v26_v8  }
  0x82   :  { %v32_v9 = vld [vmem:[#allocation0] sm:$0x1] }
  0x83   :  { %34 = vst [vmem:[%s76_s1] sm:$0x1] %v32_v9 }

// kernel: cnn_mlp_forward.1
= control target key start
LH: loop header
LB: loop body
LE: loop exit
PB: predicated region body
PF: predicated region fallthrough
CT: control target
= control target key end

     0   :  { %vm110_vm0 = vcmask 523264   ;;  %v1595_v2 = vmov 0.0|0.0   ;;  %s1596_s21 = smov 64   ;;  %vm320_vm1 = vcmask 916480   ;;  %vm445_vm2 = vcmask 850944   ;;  %s1598_s25 = smov 104   ;;  %s2370_s0 = inlined_call_operand.vmem [shape: f32[128,64], index: 0, kind: input, shape index: {}]   ;;  %s2371_s1 = inlined_call_operand.vmem [shape: f32[192,112], index: 1, kind: input, shape index: {}]   ;;  %s2372_s2 = inlined_call_operand.vmem [shape: f32[1,112], index: 2, kind: input, shape index: {}]   ;;  %s2373_s3 = inlined_call_operand.vmem [shape: f32[312,40], index: 3, kind: input, shape index: {}]   ;;  %s2374_s5 = inlined_call_operand.vmem [shape: f32[2,32,32], index: 5, kind: input, shape index: {}]   ;;  %s2375_s4 = inlined_call_operand.vmem [shape: f32[1,40], index: 4, kind: input, shape index: {}]   ;;  %s2376_s7 = inlined_call_operand.vmem [shape: f32[32,32], index: 7, kind: input, shape index: {}]   ;;  %s2377_s9 = inlined_call_operand.vmem [shape: f32[32,10], index: 9, kind: input, shape index: {}]   ;;  %s2378_s6 = inlined_call_operand.vmem [shape: f32[1,32], index: 6, kind: input, shape index: {}]   ;;  %s2379_s8 = inlined_call_operand.vmem [shape: f32[1,32], index: 8, kind: input, shape index: {}]   ;;  %s2380_s10 = inlined_call_operand.vmem [shape: f32[1,10], index: 10, kind: input, shape index: {}]   ;;  %s2381_s11 = inlined_call_operand.vmem [shape: f32[8,10], index: 11, kind: output, shape index: {}]  }
   0x1   :  { %v1665_v0 = vld [vmem:[%s2370_s0 + $0x8] sm:$0xff]  ;;  %v1670_v1 = vld [vmem:[%s2370_s0 + $0x18] sm:$0xff]  ;;  %1485 = vmatprep.subr.bf16.mxu0 %v1595_v2  ;;  %v1678_v3 = vld [vmem:[%s2370_s0 + $0x10] sm:$0xff]  ;;  %s1599_s26 = smov 80   ;;  %vm1600_vm3 = vmmov 0   ;;  %vm546_vm4 = vcmask 654336  }
   0x2   :  { %68 = vrot.lane.b32.xlu0 %v1665_v0, %s1596_s21  ;;  %72 = vrot.lane.b32.xlu1 %v1670_v1, %s1596_s21  ;;  %v1685_v4 = vld [vmem:[%s2370_s0 + $0x20] sm:$0xff]  ;;  %v1692_v5 = vld [vmem:[%s2370_s0 + $0x28] sm:$0xff]  ;;  %vm602_vm5 = vcmask 457728   ;;  %vm841_vm6 = vcmask 326656   ;;  %vm919_vm7 = vcmask 261120   ;;  %vm1263_vm8 = vcmask 80896  }
   0x3   :  { %1270 = vmatprep.mubr.msk.f32.mxu0 %vm110_vm0, %v1678_v3  ;;  %v125_v6 = vld [vmem:[%s2371_s1] sm:$0xff]  ;;  %v126_v7 = vld [vmem:[%s2371_s1 + $0x8] sm:$0xff]  ;;  %v1707_v8 = vld [vmem:[%s2370_s0 + $0x30] sm:$0xff] }
   0x4   :  { %v1486_v9 = vpack.c.bf16 %v126_v7, %v125_v6  ;;  %v127_v10 = vld [vmem:[%s2371_s1 + $0x10] sm:$0xff]  ;;  %v128_v11 = vld [vmem:[%s2371_s1 + $0x18] sm:$0xff]  ;;  %v129_v13 = vld [vmem:[%s2371_s1 + $0x20] sm:$0xff] }
   0x5   :  { %v1489_v12 = vpack.c.bf16 %v128_v11, %v127_v10  ;;  %v130_v14 = vld [vmem:[%s2371_s1 + $0x28] sm:$0xff]  ;;  %v1728_v15 = vld [vmem:[%s2370_s0 + $0x38] sm:$0xff]  ;;  %v1733_v16 = vld [vmem:[%s2370_s0 + $0x40] sm:$0xff] }
   0x6   :  { %70 = vrot.lane.b32.xlu0 %v1678_v3, %s1596_s21  ;;  %74 = vrot.lane.b32.xlu1 %v1685_v4, %s1596_s21  ;;  %v1492_v17 = vpack.c.bf16 %v130_v14, %v129_v13  ;;  %v131_v18 = vld [vmem:[%s2371_s1 + $0x30] sm:$0xff]  ;;  %v132_v19 = vld [vmem:[%s2371_s1 + $0x38] sm:$0xff] }
   0x7   :  { %1487 = vmatpush1.bf16.msra.mxu0 %v1486_v9  ;;  %v1749_v20 = vld [vmem:[%s2370_s0 + $0x48] sm:$0xff]  ;;  %v1754_v21 = vld [vmem:[%s2370_s0 + $0x50] sm:$0xff]  ;;  %v1495_v22 = vpack.c.bf16 %v132_v19, %v131_v18  ;;  %v133_v23 = vld [vmem:[%s2371_s1 + $0x40] sm:$0xff] }
   0x8   :  { %1488 = vmatprep.subr.bf16.mxu0 %v1595_v2  ;;  %v134_v24 = vld [vmem:[%s2371_s1 + $0x48] sm:$0xff]  ;;  %v1770_v25 = vld [vmem:[%s2370_s0 + $0x58] sm:$0xff]  ;;  %v1775_v26 = vld [vmem:[%s2370_s0 + $0x60] sm:$0xff] }
   0x9   :  { %v1498_v27 = vpack.c.bf16 %v134_v24, %v133_v23  ;;  %v135_v28 = vld [vmem:[%s2371_s1 + $0x50] sm:$0xff]  ;;  %v136_v29 = vld [vmem:[%s2371_s1 + $0x58] sm:$0xff]  ;;  %v1791_v30 = vld [vmem:[%s2370_s0 + $0x68] sm:$0xff] }
   0xa   :  { %76 = vrot.lane.b32.xlu0 %v1692_v5, %s1596_s21  ;;  %78 = vrot.lane.b32.xlu1 %v1707_v8, %s1596_s21  ;;  %v1796_v31 = vld [vmem:[%s2370_s0 + $0x70] sm:$0xff]  ;;  %v1501_v32 = vpack.c.bf16 %v136_v29, %v135_v28  ;;  %v137_v33 = vld [vmem:[%s2371_s1 + $0x60] sm:$0xff] }
   0xb   :  { %1490 = vmatpush1.bf16.msra.mxu0 %v1489_v12  ;;  %v138_v34 = vld [vmem:[%s2371_s1 + $0x68] sm:$0xff]  ;;  %v139_v36 = vld [vmem:[%s2371_s1 + $0x70] sm:$0xff]  ;;  %v140_v37 = vld [vmem:[%s2371_s1 + $0x78] sm:$0xff] }
   0xc   :  { %1491 = vmatprep.subr.bf16.mxu0 %v1595_v2  ;;  %v1504_v35 = vpack.c.bf16 %v138_v34, %v137_v33  ;;  %v1507_v38 = vpack.c.bf16 %v140_v37, %v139_v36  ;;  %v141_v39 = vld [vmem:[%s2371_s1 + $0x80] sm:$0xff]  ;;  %v142_v40 = vld [vmem:[%s2371_s1 + $0x88] sm:$0xff]  ;;  %v143_v42 = vld [vmem:[%s2371_s1 + $0x90] sm:$0xff] }
   0xd   :  { %v1510_v41 = vpack.c.bf16 %v142_v40, %v141_v39  ;;  %v144_v43 = vld [vmem:[%s2371_s1 + $0x98] sm:$0xff]  ;;  %v145_v45 = vld [vmem:[%s2371_s1 + $0xa0] sm:$0xff]  ;;  %v146_v46 = vld [vmem:[%s2371_s1 + $0xa8] sm:$0xff] }
   0xe   :  { %80 = vrot.lane.b32.xlu0 %v1728_v15, %s1596_s21  ;;  %82 = vrot.lane.b32.xlu1 %v1733_v16, %s1596_s21  ;;  %v1513_v44 = vpack.c.bf16 %v144_v43, %v143_v42  ;;  %v1516_v47 = vpack.c.bf16 %v146_v46, %v145_v45  ;;  %v147_v48 = vld [vmem:[%s2371_s1 + $0xb0] sm:$0xff]  ;;  %v148_v49 = vld [vmem:[%s2371_s1 + $0xb8] sm:$0xff] }
   0xf   :  { %1493 = vmatpush1.bf16.msra.mxu0 %v1492_v17  ;;  %v1519_v50 = vpack.c.bf16 %v148_v49, %v147_v48  ;;  %v38_v51 = vld [vmem:[%s2370_s0] sm:$0xff] }
  0x10   :  { %1494 = vmatprep.subr.bf16.mxu0 %v1595_v2  ;;  %v1908_v18 = vld [vmem:[%s2372_s2] ss:$0 sm:$0xff] }
  0x12   :  { %84 = vrot.lane.b32.xlu0 %v1749_v20, %s1596_s21  ;;  %86 = vrot.lane.b32.xlu1 %v1754_v21, %s1596_s21 }
  0x13   :  { %1496 = vmatpush1.bf16.msra.mxu0 %v1495_v22 }
  0x14   :  { %1497 = vmatprep.subr.bf16.mxu0 %v1595_v2 }
  0x16   :  { %88 = vrot.lane.b32.xlu0 %v1770_v25, %s1596_s21  ;;  %90 = vrot.lane.b32.xlu1 %v1775_v26, %s1596_s21 }
  0x17   :  { %1499 = vmatpush1.bf16.msra.mxu0 %v1498_v27 }
  0x18   :  { %1500 = vmatprep.subr.bf16.mxu0 %v1595_v2 }
  0x1a   :  { %92 = vrot.lane.b32.xlu0 %v1791_v30, %s1596_s21  ;;  %94 = vrot.lane.b32.xlu1 %v1796_v31, %s1596_s21 }
  0x1b   :  { %1502 = vmatpush1.bf16.msra.mxu0 %v1501_v32 }
  0x1c   :  { %1503 = vmatprep.subr.bf16.mxu0 %v1595_v2 }
  0x1f   :  { %1505 = vmatpush1.bf16.msra.mxu0 %v1504_v35 }
  0x20   :  { %1506 = vmatprep.subr.bf16.mxu0 %v1595_v2 }
  0x23   :  { %1508 = vmatpush1.bf16.msra.mxu0 %v1507_v38 }
  0x24   :  { %1509 = vmatprep.subr.bf16.mxu0 %v1595_v2 }
  0x27   :  { %1511 = vmatpush1.bf16.msra.mxu0 %v1510_v41 }
  0x28   :  { %1512 = vmatprep.subr.bf16.mxu0 %v1595_v2 }
  0x2b   :  { %1514 = vmatpush1.bf16.msra.mxu0 %v1513_v44 }
  0x2c   :  { %1515 = vmatprep.subr.bf16.mxu0 %v1595_v2 }
  0x2f   :  { %1517 = vmatpush1.bf16.msra.mxu0 %v1516_v47 }
  0x30   :  { %1518 = vmatprep.subr.bf16.mxu0 %v1595_v2 }
  0x33   :  { %1520 = vmatpush1.bf16.msra.mxu0 %v1519_v50 }
  0x34   :  { %1562 = vmatprep.subr.bf16.mxu0 %v1595_v2 }
  0x74   :  { %v69_v52 = vpop.permute.xlu0 %68  ;;  %v73_v54 = vpop.permute.xlu1 %72 }
  0x75   :  { %v111_v53 = vsel %vm110_vm0, %v38_v51, %v69_v52  ;;  %v113_v57 = vsel %vm110_vm0, %v1678_v3, %v73_v54 }
  0x76   :  { %250 = vmatmul.mubr.f32.vlgmr.msra.gmra.mrb[0].mxu0 %v111_v53 }
  0x77   :  { %1271 = vmatprep.mubr.msk.f32.mxu0 %vm110_vm0, %v1670_v1 }
  0x78   :  { %v71_v55 = vpop.permute.xlu0 %70  ;;  %v75_v58 = vpop.permute.xlu1 %74 }
  0x79   :  { %v112_v56 = vsel %vm110_vm0, %v1665_v0, %v71_v55  ;;  %v114_v59 = vsel %vm110_vm0, %v1670_v1, %v75_v58 }
  0x7a   :  { %255 = vmatmul.mubr.f32.gmra.mrb[2].mxu0 %v112_v56 }
  0x7b   :  { %1272 = vmatprep.mubr.msk.f32.mxu0 %vm110_vm0, %v1685_v4 }
  0x7c   :  { %v77_v60 = vpop.permute.xlu0 %76  ;;  %v79_v62 = vpop.permute.xlu1 %78 }
  0x7d   :  { %v115_v61 = vsel %vm110_vm0, %v1685_v4, %v77_v60  ;;  %v116_v63 = vsel %vm110_vm0, %v1692_v5, %v79_v62 }
  0x7e   :  { %260 = vmatmul.mubr.f32.gmra.mrb[4].mxu0 %v113_v57 }
  0x7f   :  { %1273 = vmatprep.mubr.msk.f32.mxu0 %vm110_vm0, %v1692_v5 }
  0x80   :  { %v81_v0 = vpop.permute.xlu0 %80  ;;  %v83_v3 = vpop.permute.xlu1 %82 }
  0x81   :  { %v117_v1 = vsel %vm110_vm0, %v1707_v8, %v81_v0  ;;  %v118_v4 = vsel %vm110_vm0, %v1728_v15, %v83_v3 }
  0x82   :  { %265 = vmatmul.mubr.f32.gmra.mrb[6].mxu0 %v114_v59 }
  0x83   :  { %1274 = vmatprep.mubr.msk.f32.mxu0 %vm110_vm0, %v1707_v8 }
  0x84   :  { %v85_v6 = vpop.permute.xlu0 %84  ;;  %v87_v7 = vpop.permute.xlu1 %86 }
  0x85   :  { %v119_v5 = vsel %vm110_vm0, %v1733_v16, %v85_v6  ;;  %v120_v8 = vsel %vm110_vm0, %v1749_v20, %v87_v7 }
  0x86   :  { %270 = vmatmul.mubr.f32.gmra.mrb[8].mxu0 %v115_v61 }
  0x87   :  { %1275 = vmatprep.mubr.msk.f32.mxu0 %vm110_vm0, %v1728_v15 }
  0x88   :  { %v89_v9 = vpop.permute.xlu0 %88  ;;  %v91_v11 = vpop.permute.xlu1 %90 }
  0x89   :  { %v121_v10 = vsel %vm110_vm0, %v1754_v21, %v89_v9  ;;  %v122_v12 = vsel %vm110_vm0, %v1770_v25, %v91_v11 }
  0x8a   :  { %275 = vmatmul.mubr.f32.gmra.mrb[10].mxu0 %v116_v63 }
  0x8b   :  { %1276 = vmatprep.mubr.msk.f32.mxu0 %vm110_vm0, %v1733_v16  ;;  %v53_v16 = vld [vmem:[%s2370_s0 + $0x78] sm:$0xff]  ;;  %s1597_s0 = smov 120  }
  0x8c   :  { %v93_v13 = vpop.permute.xlu0 %92  ;;  %v95_v15 = vpop.permute.xlu1 %94 }
  0x8d   :  { %v123_v14 = vsel %vm110_vm0, %v1775_v26, %v93_v13  ;;  %v124_v17 = vsel %vm110_vm0, %v1791_v30, %v95_v15  ;;  %v573_v13 = vld [vmem:[%s2373_s3 + $0x88] sm:$0xff] }
  0x8e   :  { %280 = vmatmul.mubr.f32.gmra.mrb[12].mxu0 %v117_v1 }
  0x8f   :  { %1277 = vmatprep.mubr.msk.f32.mxu0 %vm110_vm0, %v1749_v20 }
  0x92   :  { %285 = vmatmul.mubr.f32.gmra.mrb[14].mxu0 %v118_v4 }
  0x93   :  { %1278 = vmatprep.mubr.msk.f32.mxu0 %vm110_vm0, %v1754_v21 }
  0x96   :  { %290 = vmatmul.mubr.f32.gmra.mrb[16].mxu0 %v119_v5 }
  0x97   :  { %1279 = vmatprep.mubr.msk.f32.mxu0 %vm110_vm0, %v1770_v25 }
  0x9a   :  { %295 = vmatmul.mubr.f32.gmra.mrb[18].mxu0 %v120_v8 }
  0x9b   :  { %1280 = vmatprep.mubr.msk.f32.mxu0 %vm110_vm0, %v1775_v26 }
  0x9e   :  { %300 = vmatmul.mubr.f32.gmra.mrb[20].mxu0 %v121_v10 }
  0x9f   :  { %1281 = vmatprep.mubr.msk.f32.mxu0 %vm110_vm0, %v1791_v30 }
  0xa2   :  { %305 = vmatmul.mubr.f32.gmra.mrb[22].mxu0 %v122_v12  ;;  %v572_v12 = vld [vmem:[%s2373_s3 + $0x80] sm:$0xff] }
  0xa3   :  { %1282 = vmatprep.mubr.msk.f32.mxu0 %vm110_vm0, %v1796_v31  ;;  %v1521_v15 = vpack.c.bf16 %v573_v13, %v572_v12  ;;  %v587_v12 = vld [vmem:[%s2373_s3 + $0xf8] sm:$0xff]  ;;  %v570_v13 = vld [vmem:[%s2373_s3 + $0x70] sm:$0xff] }
  0xa5   :  { %1522 = vmatprep.subr.bf16.mxu1 %v1521_v15  ;;  %v571_v15 = vld [vmem:[%s2373_s3 + $0x78] sm:$0xff] }
  0xa6   :  { %310 = vmatmul.mubr.f32.gmra.mrb[24].mxu0 %v123_v14  ;;  %v556_v14 = vld [vmem:[%s2373_s3] sm:$0xff] }
  0xa7   :  { %1283 = vmatprep.mubr.msk.f32.mxu0 %vm110_vm0, %v53_v16  ;;  %v557_v16 = vld [vmem:[%s2373_s3 + $0x8] sm:$0xff] }
  0xaa   :  { %315 = vmatmul.mubr.f32.gmra.mrb[26].mxu0 %v124_v17  ;;  %v574_v17 = vld [vmem:[%s2373_s3 + $0x90] sm:$0xff] }
 0x149   :  { %v251_v19 = vpop.f32.mrb[0].mxu0 }
 0x14a   :  { %v252_v20 = vadd.f32 %v1908_v18, %v251_v19  ;;  %v253_v21 = vpop.f32.mrb[1].mxu0  ;;  %v1523_v19 = vpack.c.bf16 %v557_v16, %v556_v14  ;;  %v1551_v16 = vpack.c.bf16 %v571_v15, %v570_v13  ;;  %v589_v15 = vld [vmem:[%s2373_s3 + $0x108] sm:$0xff] }
 0x14b   :  { %v558_v21 = vld [vmem:[%s2373_s3 + $0x10] sm:$0xff] }
 0x14c   :  { %321 = vst.msk [vmem:[#allocation2] sm:$0xff] %vm320_vm1, %v252_v20  ;;  %1524 = vmatpush3.bf16.msra.mxu1 %v1523_v19 }
 0x14d   :  { %v256_v22 = vpop.f32.mrb[2].mxu0 }
 0x14e   :  { %v257_v23 = vadd.f32 %v1908_v18, %v256_v22  ;;  %v258_v24 = vpop.f32.mrb[3].mxu0  ;;  %v559_v22 = vld [vmem:[%s2373_s3 + $0x18] sm:$0xff] }
 0x14f   :  { %v577_v24 = vld [vmem:[%s2373_s3 + $0xa8] sm:$0xff] }
 0x150   :  { %322 = vst.msk [vmem:[#allocation2 + $0x8] sm:$0xff] %vm320_vm1, %v257_v23  ;;  %v576_v23 = vld [vmem:[%s2373_s3 + $0xa0] sm:$0xff] }
 0x151   :  { %v261_v25 = vpop.f32.mrb[4].mxu0 }
 0x152   :  { %v262_v26 = vadd.f32 %v1908_v18, %v261_v25  ;;  %v263_v27 = vpop.f32.mrb[5].mxu0  ;;  %v1527_v25 = vpack.c.bf16 %v559_v22, %v558_v21 }
 0x153   :  { %v1984_v10 = vld [vmem:[#allocation2] sm:$0xff] }
 0x154   :  { %323 = vst.msk [vmem:[#allocation2 + $0x10] sm:$0xff] %vm320_vm1, %v262_v26  ;;  %v1529_v26 = vpack.c.bf16 %v577_v24, %v576_v23  ;;  %v560_v27 = vld [vmem:[%s2373_s3 + $0x20] sm:$0xff] }
 0x155   :  { %v266_v28 = vpop.f32.mrb[6].mxu0 }
 0x156   :  { %v267_v29 = vadd.f32 %v1908_v18, %v266_v28  ;;  %v268_v30 = vpop.f32.mrb[7].mxu0  ;;  %v561_v28 = vld [vmem:[%s2373_s3 + $0x28] sm:$0xff] }
 0x157   :  { %v1990_v11 = vld [vmem:[#allocation2 + $0x8] sm:$0xff]  ;;  %v579_v30 = vld [vmem:[%s2373_s3 + $0xb8] sm:$0xff] }
 0x158   :  { %324 = vst.msk [vmem:[#allocation2 + $0x18] sm:$0xff] %vm320_vm1, %v267_v29  ;;  %v578_v29 = vld [vmem:[%s2373_s3 + $0xb0] sm:$0xff] }
 0x159   :  { %v271_v31 = vpop.f32.mrb[8].mxu0 }
 0x15a   :  { %v272_v32 = vadd.f32 %v1908_v18, %v271_v31  ;;  %v273_v33 = vpop.f32.mrb[9].mxu0  ;;  %v1531_v31 = vpack.c.bf16 %v561_v28, %v560_v27 }
 0x15b   :  { %v1919_v34 = vld [vmem:[#allocation2 + $0x10] sm:$0xff] }
 0x15c   :  { %325 = vst.msk [vmem:[#allocation2 + $0x20] sm:$0xff] %vm320_vm1, %v272_v32  ;;  %365 = vrot.lane.b32.xlu0 %v1919_v34, %s1597_s0  ;;  %v1533_v32 = vpack.c.bf16 %v579_v30, %v578_v29  ;;  %v562_v33 = vld [vmem:[%s2373_s3 + $0x30] sm:$0xff] }
 0x15d   :  { %v276_v35 = vpop.f32.mrb[10].mxu0 }
 0x15e   :  { %v277_v36 = vadd.f32 %v1908_v18, %v276_v35  ;;  %v278_v37 = vpop.f32.mrb[11].mxu0  ;;  %v563_v35 = vld [vmem:[%s2373_s3 + $0x38] sm:$0xff] }
 0x15f   :  { %v1925_v38 = vld [vmem:[#allocation2 + $0x18] sm:$0xff]  ;;  %v581_v37 = vld [vmem:[%s2373_s3 + $0xc8] sm:$0xff] }
 0x160   :  { %326 = vst.msk [vmem:[#allocation2 + $0x28] sm:$0xff] %vm320_vm1, %v277_v36  ;;  %367 = vrot.lane.b32.xlu1 %v1925_v38, %s1597_s0  ;;  %v580_v36 = vld [vmem:[%s2373_s3 + $0xc0] sm:$0xff] }
 0x161   :  { %v281_v39 = vpop.f32.mrb[12].mxu0 }
 0x162   :  { %v282_v40 = vadd.f32 %v1908_v18, %v281_v39  ;;  %v283_v41 = vpop.f32.mrb[13].mxu0  ;;  %v1535_v39 = vpack.c.bf16 %v563_v35, %v562_v33 }
 0x163   :  { %v1931_v42 = vld [vmem:[#allocation2 + $0x20] sm:$0xff] }
 0x164   :  { %327 = vst.msk [vmem:[#allocation2 + $0x30] sm:$0xff] %vm320_vm1, %v282_v40  ;;  %369 = vrot.lane.b32.xlu0 %v1931_v42, %s1597_s0  ;;  %v1537_v40 = vpack.c.bf16 %v581_v37, %v580_v36  ;;  %v564_v41 = vld [vmem:[%s2373_s3 + $0x40] sm:$0xff] }
 0x165   :  { %v286_v43 = vpop.f32.mrb[14].mxu0 }
 0x166   :  { %v287_v44 = vadd.f32 %v1908_v18, %v286_v43  ;;  %v288_v45 = vpop.f32.mrb[15].mxu0  ;;  %v565_v43 = vld [vmem:[%s2373_s3 + $0x48] sm:$0xff] }
 0x167   :  { %v1937_v46 = vld [vmem:[#allocation2 + $0x28] sm:$0xff]  ;;  %v583_v45 = vld [vmem:[%s2373_s3 + $0xd8] sm:$0xff] }
 0x168   :  { %328 = vst.msk [vmem:[#allocation2 + $0x38] sm:$0xff] %vm320_vm1, %v287_v44  ;;  %371 = vrot.lane.b32.xlu1 %v1937_v46, %s1597_s0  ;;  %v582_v44 = vld [vmem:[%s2373_s3 + $0xd0] sm:$0xff] }
 0x169   :  { %v291_v47 = vpop.f32.mrb[16].mxu0 }
 0x16a   :  { %v292_v48 = vadd.f32 %v1908_v18, %v291_v47  ;;  %v293_v49 = vpop.f32.mrb[17].mxu0  ;;  %v1539_v47 = vpack.c.bf16 %v565_v43, %v564_v41 }
 0x16b   :  { %v1943_v50 = vld [vmem:[#allocation2 + $0x30] sm:$0xff] }
 0x16c   :  { %329 = vst.msk [vmem:[#allocation2 + $0x40] sm:$0xff] %vm320_vm1, %v292_v48  ;;  %373 = vrot.lane.b32.xlu0 %v1943_v50, %s1597_s0  ;;  %v1541_v48 = vpack.c.bf16 %v583_v45, %v582_v44  ;;  %v566_v49 = vld [vmem:[%s2373_s3 + $0x50] sm:$0xff] }
 0x16d   :  { %v296_v51 = vpop.f32.mrb[18].mxu0 }
 0x16e   :  { %v297_v52 = vadd.f32 %v1908_v18, %v296_v51  ;;  %v298_v53 = vpop.f32.mrb[19].mxu0  ;;  %v567_v51 = vld [vmem:[%s2373_s3 + $0x58] sm:$0xff] }
 0x16f   :  { %v1949_v54 = vld [vmem:[#allocation2 + $0x38] sm:$0xff] }
 0x170   :  { %330 = vst.msk [vmem:[#allocation2 + $0x48] sm:$0xff] %vm320_vm1, %v297_v52  ;;  %375 = vrot.lane.b32.xlu1 %v1949_v54, %s1597_s0  ;;  %v1543_v52 = vpack.c.bf16 %v567_v51, %v566_v49 }
 0x171   :  { %v301_v55 = vpop.f32.mrb[20].mxu0 }
 0x172   :  { %v302_v56 = vadd.f32 %v1908_v18, %v301_v55  ;;  %v303_v57 = vpop.f32.mrb[21].mxu0 }
 0x173   :  { %v1955_v58 = vld [vmem:[#allocation2 + $0x40] sm:$0xff] }
 0x174   :  { %331 = vst.msk [vmem:[#allocation2 + $0x50] sm:$0xff] %vm320_vm1, %v302_v56  ;;  %377 = vrot.lane.b32.xlu0 %v1955_v58, %s1597_s0 }
 0x175   :  { %v306_v59 = vpop.f32.mrb[22].mxu0 }
 0x176   :  { %v307_v60 = vadd.f32 %v1908_v18, %v306_v59  ;;  %v308_v61 = vpop.f32.mrb[23].mxu0  ;;  %v584_v59 = vld [vmem:[%s2373_s3 + $0xe0] sm:$0xff] }
 0x177   :  { %v1961_v62 = vld [vmem:[#allocation2 + $0x48] sm:$0xff]  ;;  %v568_v61 = vld [vmem:[%s2373_s3 + $0x60] sm:$0xff] }
 0x178   :  { %332 = vst.msk [vmem:[#allocation2 + $0x58] sm:$0xff] %vm320_vm1, %v307_v60  ;;  %379 = vrot.lane.b32.xlu1 %v1961_v62, %s1597_s0  ;;  %v585_v60 = vld [vmem:[%s2373_s3 + $0xe8] sm:$0xff] }
 0x179   :  { %v311_v63 = vpop.f32.mrb[24].mxu0 }
 0x17a   :  { %v312_v0 = vadd.f32 %v1908_v18, %v311_v63  ;;  %v313_v1 = vpop.f32.mrb[25].mxu0  ;;  %v1545_v63 = vpack.c.bf16 %v585_v60, %v584_v59 }
 0x17b   :  { %v1967_v3 = vld [vmem:[#allocation2 + $0x50] sm:$0xff] }
 0x17c   :  { %333 = vst.msk [vmem:[#allocation2 + $0x60] sm:$0xff] %vm320_vm1, %v312_v0  ;;  %381 = vrot.lane.b32.xlu0 %v1967_v3, %s1597_s0 }
 0x17d   :  { %v316_v4 = vpop.f32.mrb[26].mxu0 }
 0x17e   :  { %v317_v6 = vadd.f32 %v1908_v18, %v316_v4  ;;  %v318_v5 = vpop.f32.mrb[27].mxu0  ;;  %v575_v18 = vld [vmem:[%s2373_s3 + $0x98] sm:$0xff] }
 0x17f   :  { %v1973_v7 = vld [vmem:[#allocation2 + $0x58] sm:$0xff]  ;;  %v1525_v20 = vpack.c.bf16 %v575_v18, %v574_v17  ;;  %v586_v5 = vld [vmem:[%s2373_s3 + $0xf0] sm:$0xff] }
 0x180   :  { %334 = vst.msk [vmem:[#allocation2 + $0x68] sm:$0xff] %vm320_vm1, %v317_v6  ;;  %383 = vrot.lane.b32.xlu1 %v1973_v7, %s1597_s0  ;;  %v1549_v14 = vpack.c.bf16 %v587_v12, %v586_v5 }
 0x181   :  { %1526 = vmatprep.subr.bf16.mxu1 %v1525_v20 }
 0x182   :  { %1528 = vmatpush3.bf16.msra.mxu1 %v1527_v25 }
 0x183   :  { %v1978_v8 = vld [vmem:[#allocation2 + $0x60] sm:$0xff]  ;;  %1530 = vmatprep.subr.bf16.mxu1 %v1529_v26 }
 0x184   :  { %385 = vrot.lane.b32.xlu0 %v1978_v8, %s1597_s0 }
 0x186   :  { %1532 = vmatpush3.bf16.msra.mxu1 %v1531_v31 }
 0x187   :  { %v1982_v9 = vld [vmem:[#allocation2 + $0x68] sm:$0xff]  ;;  %1534 = vmatprep.subr.bf16.mxu1 %v1533_v32 }
 0x188   :  { %415 = vrot.lane.b32.xlu1 %v1982_v9, %s1597_s0  ;;  %361 = vrot.lane.b32.xlu0 %v1984_v10, %s1597_s0 }
 0x18a   :  { %1536 = vmatpush3.bf16.msra.mxu1 %v1535_v39 }
 0x18b   :  { %1538 = vmatprep.subr.bf16.mxu1 %v1537_v40 }
 0x18c   :  { %363 = vrot.lane.b32.xlu1 %v1990_v11, %s1597_s0 }
 0x18e   :  { %1540 = vmatpush3.bf16.msra.mxu1 %v1539_v47 }
 0x18f   :  { %1542 = vmatprep.subr.bf16.mxu1 %v1541_v48 }
 0x192   :  { %1544 = vmatpush3.bf16.msra.mxu1 %v1543_v52 }
 0x193   :  { %1546 = vmatprep.subr.bf16.mxu1 %v1545_v63 }
 0x1ce   :  { %v366_v53 = vpop.permute.xlu0 %365 }
 0x1cf   :  { %v2067_v56 = vmax.f32 %v1919_v34, %v366_v53  ;;  %v569_v34 = vld [vmem:[%s2373_s3 + $0x68] sm:$0xff] }
 0x1d2   :  { %v368_v55 = vpop.permute.xlu1 %367 }
 0x1d3   :  { %v403_v57 = vmax.f32 %v1925_v38, %v368_v55  ;;  %v1547_v38 = vpack.c.bf16 %v569_v34, %v568_v61 }
 0x1d5   :  { %v421_v0 = vmax.f32 %v2067_v56, %v403_v57  ;;  %1548 = vmatpush3.bf16.msra.mxu1 %v1547_v38 }
 0x1d6   :  { %v370_v1 = vpop.permute.xlu0 %369  ;;  %1550 = vmatprep.subr.bf16.mxu1 %v1549_v14 }
 0x1d7   :  { %v434_v4 = vmax.f32 %v421_v0, 0.0  ;;  %v404_v6 = vmax.f32 %v1931_v42, %v370_v1  ;;  %v1601_v1 = vmov 0.0  }
 0x1d8   :  { %1449 = vmatprep.mubr.msk.f32.mxu0 %vm1600_vm3, %v1601_v1 }
 0x1d9   :  { %448 = vst.msk [vmem:[#allocation3 + $0x10] sm:$0xff] %vm445_vm2, %v434_v4  ;;  %v422_v42 = vmax.f32 %v403_v57, %v404_v6  ;;  %1552 = vmatpush3.bf16.msra.mxu1 %v1551_v16 }
 0x1da   :  { %v372_v17 = vpop.permute.xlu1 %371  ;;  %1553 = vmatprep.subr.bf16.mxu1 %v1595_v2 }
 0x1db   :  { %v435_v18 = vmax.f32 %v422_v42, 0.0  ;;  %v405_v19 = vmax.f32 %v1937_v46, %v372_v17 }
 0x1dd   :  { %449 = vst.msk [vmem:[#allocation3 + $0x18] sm:$0xff] %vm445_vm2, %v435_v18  ;;  %v423_v20 = vmax.f32 %v404_v6, %v405_v19 }
 0x1de   :  { %v374_v21 = vpop.permute.xlu0 %373 }
 0x1df   :  { %v436_v22 = vmax.f32 %v423_v20, 0.0  ;;  %v406_v23 = vmax.f32 %v1943_v50, %v374_v21  ;;  %v590_v20 = vld [vmem:[%s2373_s3 + $0x110] sm:$0xff]  ;;  %v591_v21 = vld [vmem:[%s2373_s3 + $0x118] sm:$0xff] }
 0x1e0   :  { %v2101_v24 = vld [vmem:[#allocation3 + $0x10] sm:$0xff] }
 0x1e1   :  { %450 = vst.msk [vmem:[#allocation3 + $0x20] sm:$0xff] %vm445_vm2, %v436_v22  ;;  %v424_v25 = vmax.f32 %v405_v19, %v406_v23  ;;  %481 = vrot.lane.b32.xlu0 %v2101_v24, %s1598_s25 }
 0x1e2   :  { %v376_v46 = vpop.permute.xlu1 %375 }
 0x1e3   :  { %v437_v26 = vmax.f32 %v424_v25, 0.0  ;;  %v407_v27 = vmax.f32 %v1949_v54, %v376_v46  ;;  %v1557_v46 = vpack.c.bf16 %v591_v21, %v590_v20 }
 0x1e4   :  { %v2107_v28 = vld [vmem:[#allocation3 + $0x18] sm:$0xff] }
 0x1e5   :  { %451 = vst.msk [vmem:[#allocation3 + $0x28] sm:$0xff] %vm445_vm2, %v437_v26  ;;  %v425_v29 = vmax.f32 %v406_v23, %v407_v27  ;;  %483 = vrot.lane.b32.xlu0 %v2107_v28, %s1598_s25 }
 0x1e6   :  { %v378_v50 = vpop.permute.xlu0 %377 }
 0x1e7   :  { %v438_v30 = vmax.f32 %v425_v29, 0.0  ;;  %v408_v31 = vmax.f32 %v1955_v58, %v378_v50  ;;  %v592_v29 = vld [vmem:[%s2373_s3 + $0x120] sm:$0xff]  ;;  %v593_v50 = vld [vmem:[%s2373_s3 + $0x128] sm:$0xff] }
 0x1e8   :  { %v2113_v32 = vld [vmem:[#allocation3 + $0x20] sm:$0xff] }
 0x1e9   :  { %452 = vst.msk [vmem:[#allocation3 + $0x30] sm:$0xff] %vm445_vm2, %v438_v30  ;;  %v426_v33 = vmax.f32 %v407_v27, %v408_v31  ;;  %510 = vrot.lane.b32.xlu1 %v2113_v32, %s1599_s26  ;;  %485 = vrot.lane.b32.xlu0 %v2113_v32, %s1598_s25 }
 0x1ea   :  { %v380_v54 = vpop.permute.xlu1 %379 }
 0x1eb   :  { %v439_v35 = vmax.f32 %v426_v33, 0.0  ;;  %v409_v36 = vmax.f32 %v1961_v62, %v380_v54  ;;  %v1560_v54 = vpack.c.bf16 %v593_v50, %v592_v29  ;;  %v928_v29 = vld [vmem:[%s2374_s5] sm:$0xff]  ;;  %v929_v50 = vld [vmem:[%s2374_s5 + $0x8] sm:$0xff] }
 0x1ec   :  { %v2121_v37 = vld [vmem:[#allocation3 + $0x28] sm:$0xff] }
 0x1ed   :  { %453 = vst.msk [vmem:[#allocation3 + $0x38] sm:$0xff] %vm445_vm2, %v439_v35  ;;  %v427_v58 = vmax.f32 %v408_v31, %v409_v36  ;;  %512 = vrot.lane.b32.xlu1 %v2121_v37, %s1599_s26  ;;  %487 = vrot.lane.b32.xlu0 %v2121_v37, %s1598_s25 }
 0x1ee   :  { %v382_v39 = vpop.permute.xlu0 %381 }
 0x1ef   :  { %v440_v40 = vmax.f32 %v427_v58, 0.0  ;;  %v410_v41 = vmax.f32 %v1967_v3, %v382_v39 }
 0x1f0   :  { %v2129_v43 = vld [vmem:[#allocation3 + $0x30] sm:$0xff] }
 0x1f1   :  { %454 = vst.msk [vmem:[#allocation3 + $0x40] sm:$0xff] %vm445_vm2, %v440_v40  ;;  %v428_v62 = vmax.f32 %v409_v36, %v410_v41  ;;  %514 = vrot.lane.b32.xlu1 %v2129_v43, %s1599_s26  ;;  %489 = vrot.lane.b32.xlu0 %v2129_v43, %s1598_s25 }
 0x1f2   :  { %v384_v44 = vpop.permute.xlu1 %383 }
 0x1f3   :  { %v441_v45 = vmax.f32 %v428_v62, 0.0  ;;  %v411_v47 = vmax.f32 %v1973_v7, %v384_v44 }
 0x1f4   :  { %v2137_v48 = vld [vmem:[#allocation3 + $0x38] sm:$0xff] }
 0x1f5   :  { %455 = vst.msk [vmem:[#allocation3 + $0x48] sm:$0xff] %vm445_vm2, %v441_v45  ;;  %v429_v3 = vmax.f32 %v410_v41, %v411_v47  ;;  %516 = vrot.lane.b32.xlu1 %v2137_v48, %s1599_s26  ;;  %491 = vrot.lane.b32.xlu0 %v2137_v48, %s1598_s25  ;;  %v594_v41 = vld [vmem:[%s2373_s3 + $0x130] sm:$0xff] }
 0x1f6   :  { %v386_v49 = vpop.permute.xlu0 %385 }
 0x1f7   :  { %v442_v51 = vmax.f32 %v429_v3, 0.0  ;;  %v412_v52 = vmax.f32 %v1978_v8, %v386_v49 }
 0x1f8   :  { %v2145_v53 = vld [vmem:[#allocation3 + $0x40] sm:$0xff] }
 0x1f9   :  { %456 = vst.msk [vmem:[#allocation3 + $0x50] sm:$0xff] %vm445_vm2, %v442_v51  ;;  %v430_v7 = vmax.f32 %v411_v47, %v412_v52  ;;  %518 = vrot.lane.b32.xlu1 %v2145_v53, %s1599_s26  ;;  %493 = vrot.lane.b32.xlu0 %v2145_v53, %s1598_s25 }
 0x1fa   :  { %v416_v55 = vpop.permute.xlu1 %415  ;;  %v362_v60 = vpop.permute.xlu0 %361 }
 0x1fb   :  { %v443_v57 = vmax.f32 %v430_v7, 0.0  ;;  %v418_v59 = vmax.f32 %v1982_v9, %v416_v55  ;;  %v400_v0 = vmax.f32 %v1984_v10, %v362_v60 }
 0x1fc   :  { %v468_v61 = vld [vmem:[#allocation3 + $0x48] sm:$0xff] }
 0x1fd   :  { %457 = vst.msk [vmem:[#allocation3 + $0x58] sm:$0xff] %vm445_vm2, %v443_v57  ;;  %v431_v8 = vmax.f32 %v412_v52, %v418_v59  ;;  %520 = vrot.lane.b32.xlu1 %v468_v61, %s1599_s26  ;;  %495 = vrot.lane.b32.xlu0 %v468_v61, %s1598_s25 }
 0x1fe   :  { %v364_v63 = vpop.permute.xlu1 %363 }
 0x1ff   :  { %v444_v34 = vmax.f32 %v431_v8, 0.0  ;;  %v401_v38 = vmax.f32 %v1990_v11, %v364_v63 }
 0x200   :  { %v469_v9 = vld [vmem:[#allocation3 + $0x50] sm:$0xff] }
 0x201   :  { %458 = vst.msk [vmem:[#allocation3 + $0x60] sm:$0xff] %vm445_vm2, %v444_v34  ;;  %v419_v4 = vmax.f32 %v400_v0, %v401_v38  ;;  %v420_v6 = vmax.f32 %v401_v38, %v2067_v56  ;;  %522 = vrot.lane.b32.xlu1 %v469_v9, %s1599_s26  ;;  %497 = vrot.lane.b32.xlu0 %v469_v9, %s1598_s25  ;;  %v588_v56 = vld [vmem:[%s2373_s3 + $0x100] sm:$0xff] }
 0x202   :  { %v1554_v17 = vpack.c.bf16 %v589_v15, %v588_v56 }
 0x203   :  { %v432_v5 = vmax.f32 %v419_v4, 0.0  ;;  %v433_v12 = vmax.f32 %v420_v6, 0.0 }
 0x204   :  { %v470_v10 = vld [vmem:[#allocation3 + $0x58] sm:$0xff] }
 0x205   :  { %446 = vst.msk [vmem:[#allocation3] sm:$0xff] %vm445_vm2, %v432_v5  ;;  %447 = vst.msk [vmem:[#allocation3 + $0x8] sm:$0xff] %vm445_vm2, %v433_v12  ;;  %524 = vrot.lane.b32.xlu1 %v470_v10, %s1599_s26 }
 0x208   :  { %v471_v11 = vld [vmem:[#allocation3 + $0x60] sm:$0xff] }
 0x209   :  { %526 = vrot.lane.b32.xlu1 %v471_v11, %s1599_s26 }
 0x20c   :  { %v459_v19 = vld [vmem:[#allocation3] sm:$0xff]  ;;  %v460_v27 = vld [vmem:[#allocation3 + $0x8] sm:$0xff] }
 0x253   :  { %v482_v13 = vpop.permute.xlu0 %481 }
 0x254   :  { %v537_v22 = vsel %vm445_vm2, %v459_v19, %v482_v13 }
 0x257   :  { %v484_v14 = vpop.permute.xlu0 %483 }
 0x258   :  { %v538_v30 = vsel %vm445_vm2, %v460_v27, %v484_v14 }
 0x25b   :  { %v2174_v42 = vpop.permute.xlu1 %510  ;;  %v486_v16 = vpop.permute.xlu0 %485 }
 0x25c   :  { %v547_v18 = vsel %vm546_vm4, %v482_v13, %v2174_v42  ;;  %v539_v36 = vsel %vm445_vm2, %v2101_v24, %v486_v16 }
 0x25d   :  { %685 = vmatprep.mubr.f32.mxu1 %v547_v18 }
 0x25e   :  { %686 = vmatmul.mubr.f32.vlgmr.msra.gmra.mrb[0].mxu1 %v537_v22 }
 0x25f   :  { %1555 = vmatpush3.bf16.msra.mxu1 %v1554_v17  ;;  %v2185_v23 = vpop.permute.xlu1 %512  ;;  %v488_v25 = vpop.permute.xlu0 %487 }
 0x260   :  { %v548_v26 = vsel %vm546_vm4, %v484_v14, %v2185_v23  ;;  %1556 = vmatprep.subr.bf16.mxu1 %v1595_v2  ;;  %v540_v62 = vsel %vm445_vm2, %v2107_v28, %v488_v25 }
 0x261   :  { %690 = vmatprep.mubr.f32.mxu1 %v548_v26 }
 0x262   :  { %691 = vmatmul.mubr.f32.gmra.mrb[2].mxu1 %v538_v30 }
 0x263   :  { %v515_v31 = vpop.permute.xlu1 %514  ;;  %v490_v33 = vpop.permute.xlu0 %489  ;;  %1558 = vmatpush3.bf16.msra.mxu1 %v1557_v46  ;;  %v2265_v46 = vld [vmem:[%s2375_s4] ss:$0 sm:$0xff] }
 0x264   :  { %v549_v35 = vsel %vm546_vm4, %v486_v16, %v515_v31  ;;  %1559 = vmatprep.subr.bf16.mxu1 %v1595_v2  ;;  %v541_v45 = vsel %vm445_vm2, %v2113_v32, %v490_v33 }
 0x265   :  { %695 = vmatprep.mubr.f32.mxu1 %v549_v35 }
 0x266   :  { %696 = vmatmul.mubr.f32.gmra.mrb[4].mxu1 %v539_v36 }
 0x267   :  { %v517_v58 = vpop.permute.xlu1 %516  ;;  %1561 = vmatpush3.bf16.msra.mxu1 %v1560_v54  ;;  %v492_v39 = vpop.permute.xlu0 %491 }
 0x268   :  { %v550_v40 = vsel %vm546_vm4, %v488_v25, %v517_v58  ;;  %1412 = vmatprep.subr.mxu1 %v1601_v1  ;;  %v542_v28 = vsel %vm445_vm2, %v2121_v37, %v492_v39 }
 0x269   :  { %700 = vmatprep.mubr.f32.mxu1 %v550_v40 }
 0x26a   :  { %701 = vmatmul.mubr.f32.gmra.mrb[6].mxu1 %v540_v62 }
 0x26b   :  { %v519_v44 = vpop.permute.xlu1 %518  ;;  %1413 = vmatpush3.msra.mxu1 %v594_v41  ;;  %v494_v47 = vpop.permute.xlu0 %493 }
 0x26c   :  { %v551_v24 = vsel %vm546_vm4, %v490_v33, %v519_v44  ;;  %1568 = vmatprep.subr.bf16.mxu1 %v1595_v2  ;;  %v543_v55 = vsel %vm445_vm2, %v2129_v43, %v494_v47  ;;  %v1294_v43 = vld [vmem:[%s2374_s5 + $0x20] sm:$0xff] }
 0x26d   :  { %705 = vmatprep.mubr.f32.mxu1 %v551_v24 }
 0x26e   :  { %706 = vmatmul.mubr.f32.gmra.mrb[8].mxu1 %v541_v45 }
 0x26f   :  { %v521_v3 = vpop.permute.xlu1 %520  ;;  %v496_v52 = vpop.permute.xlu0 %495 }
 0x270   :  { %v552_v49 = vsel %vm546_vm4, %v492_v39, %v521_v3  ;;  %v544_v59 = vsel %vm445_vm2, %v2137_v48, %v496_v52  ;;  %v1295_v48 = vld [vmem:[%s2374_s5 + $0x28] sm:$0xff] }
 0x271   :  { %710 = vmatprep.mubr.f32.mxu1 %v552_v49  ;;  %v1296_v49 = vld [vmem:[%s2374_s5 + $0x30] sm:$0xff] }
 0x272   :  { %711 = vmatmul.mubr.f32.gmra.mrb[10].mxu1 %v542_v28  ;;  %v1297_v28 = vld [vmem:[%s2374_s5 + $0x38] sm:$0xff] }
 0x273   :  { %v523_v51 = vpop.permute.xlu1 %522  ;;  %v498_v60 = vpop.permute.xlu0 %497 }
 0x274   :  { %v553_v7 = vsel %vm546_vm4, %v494_v47, %v523_v51  ;;  %v545_v8 = vsel %vm445_vm2, %v2145_v53, %v498_v60  ;;  %v1563_v53 = vpack.c.bf16 %v1295_v48, %v1294_v43 }
 0x275   :  { %715 = vmatprep.mubr.f32.mxu1 %v553_v7  ;;  %v1566_v7 = vpack.c.bf16 %v1297_v28, %v1296_v49 }
 0x276   :  { %716 = vmatmul.mubr.f32.gmra.mrb[12].mxu1 %v543_v55  ;;  %1564 = vmatpush3.bf16.msra.mxu0 %v1563_v53  ;;  %v930_v55 = vld [vmem:[%s2374_s5 + $0x10] sm:$0xff] }
 0x277   :  { %v525_v32 = vpop.permute.xlu1 %524  ;;  %1565 = vmatprep.subr.bf16.mxu0 %v1595_v2 }
 0x278   :  { %v554_v57 = vsel %vm546_vm4, %v496_v52, %v525_v32 }
 0x279   :  { %720 = vmatprep.mubr.f32.mxu1 %v554_v57 }
 0x27a   :  { %721 = vmatmul.mubr.f32.gmra.mrb[14].mxu1 %v544_v59  ;;  %1567 = vmatpush3.bf16.msra.mxu0 %v1566_v7  ;;  %v1300_v7 = vld [vmem:[%s2378_s6] ss:$0 sm:$0xff] }
 0x27b   :  { %v527_v37 = vpop.permute.xlu1 %526  ;;  %1574 = vmatprep.subr.bf16.mxu0 %v1595_v2 }
 0x27c   :  { %v555_v61 = vsel %vm546_vm4, %v498_v60, %v527_v37 }
 0x27d   :  { %725 = vmatprep.mubr.f32.mxu1 %v555_v61 }
 0x27e   :  { %726 = vmatmul.mubr.f32.gmra.mrb[16].mxu1 %v545_v8 }
 0x27f   :  { %1414 = vmatprep.mubr.msk.f32.mxu1 %vm1600_vm3, %v1601_v1 }
 0x282   :  { %1415 = vmatmul.mubr.msk.f32.vlgmr.msra.gmra.mrb[18].mxu1 %vm602_vm5, %v2174_v42 }
 0x283   :  { %1417 = vmatprep.mubr.msk.f32.mxu1 %vm1600_vm3, %v1601_v1 }
 0x286   :  { %1418 = vmatmul.mubr.msk.f32.gmra.mrb[20].mxu1 %vm602_vm5, %v2185_v23 }
 0x287   :  { %1420 = vmatprep.mubr.msk.f32.mxu1 %vm1600_vm3, %v1601_v1 }
 0x28a   :  { %1421 = vmatmul.mubr.msk.f32.gmra.mrb[22].mxu1 %vm602_vm5, %v515_v31  ;;  %v1569_v31 = vpack.c.bf16 %v929_v50, %v928_v29 }
 0x28b   :  { %1423 = vmatprep.mubr.msk.f32.mxu1 %vm1600_vm3, %v1601_v1 }
 0x28c   :  { %1570 = vmatpush3.bf16.msra.mxu1 %v1569_v31 }
 0x28d   :  { %1571 = vmatprep.subr.bf16.mxu1 %v1595_v2 }
 0x28e   :  { %1424 = vmatmul.mubr.msk.f32.gmra.mrb[24].mxu1 %vm602_vm5, %v517_v58 }
 0x28f   :  { %1426 = vmatprep.mubr.msk.f32.mxu1 %vm1600_vm3, %v1601_v1 }
 0x292   :  { %1427 = vmatmul.mubr.msk.f32.gmra.mrb[26].mxu1 %vm602_vm5, %v519_v44 }
 0x293   :  { %1429 = vmatprep.mubr.msk.f32.mxu1 %vm1600_vm3, %v1601_v1 }
 0x296   :  { %1430 = vmatmul.mubr.msk.f32.gmra.mrb[28].mxu1 %vm602_vm5, %v521_v3 }
 0x297   :  { %1432 = vmatprep.mubr.msk.f32.mxu1 %vm1600_vm3, %v1601_v1 }
 0x29a   :  { %1433 = vmatmul.mubr.msk.f32.gmra.mrb[30].mxu1 %vm602_vm5, %v523_v51 }
 0x29b   :  { %1435 = vmatprep.mubr.msk.f32.mxu1 %vm1600_vm3, %v1601_v1 }
 0x29e   :  { %1436 = vmatmul.mubr.msk.f32.gmra.mrb[32].mxu1 %vm602_vm5, %v525_v32  ;;  %v931_v32 = vld [vmem:[%s2374_s5 + $0x18] sm:$0xff] }
 0x29f   :  { %1438 = vmatprep.mubr.msk.f32.mxu1 %vm1600_vm3, %v1601_v1  ;;  %v1572_v59 = vpack.c.bf16 %v931_v32, %v930_v55 }
 0x2a1   :  { %1573 = vmatpush3.bf16.msra.mxu1 %v1572_v59 }
 0x2a2   :  { %1439 = vmatmul.mubr.msk.f32.gmra.mrb[34].mxu1 %vm602_vm5, %v527_v37  ;;  %1580 = vmatprep.subr.bf16.mxu1 %v1595_v2 }
 0x2a3   :  { %1460 = vmatprep.mubr.msk.f32.mxu1 %vm1600_vm3, %v1601_v1 }
 0x331   :  { %v1337_v63 = vpop.f32.mrb[0].mxu1 }
 0x332   :  { %v1338_v34 = vpop.f32.mrb[1].mxu1 }
 0x333   :  { %v1339_v0 = vadd.f32 %v1338_v34, %v1337_v63 }
 0x335   :  { %v1340_v38 = vpop.f32.mrb[2].mxu1  ;;  %v688_v30 = vadd.f32 %v1339_v0, %v2265_v46 }
 0x336   :  { %v1341_v9 = vpop.f32.mrb[3].mxu1 }
 0x337   :  { %v1342_v4 = vadd.f32 %v1341_v9, %v1340_v38 }
 0x339   :  { %v1343_v6 = vpop.f32.mrb[4].mxu1  ;;  %v693_v36 = vadd.f32 %v1342_v4, %v2265_v46 }
 0x33a   :  { %v1344_v5 = vpop.f32.mrb[5].mxu1 }
 0x33b   :  { %v1345_v12 = vadd.f32 %v1344_v5, %v1343_v6 }
 0x33d   :  { %v1346_v10 = vpop.f32.mrb[6].mxu1  ;;  %v698_v41 = vadd.f32 %v1345_v12, %v2265_v46 }
 0x33e   :  { %v1347_v11 = vpop.f32.mrb[7].mxu1 }
 0x33f   :  { %v1348_v13 = vadd.f32 %v1347_v11, %v1346_v10 }
 0x341   :  { %v1349_v14 = vpop.f32.mrb[8].mxu1  ;;  %v703_v47 = vadd.f32 %v1348_v13, %v2265_v46 }
 0x342   :  { %v1350_v56 = vpop.f32.mrb[9].mxu1 }
 0x343   :  { %v1351_v15 = vadd.f32 %v1350_v56, %v1349_v14 }
 0x345   :  { %v1352_v42 = vpop.f32.mrb[10].mxu1  ;;  %v708_v57 = vadd.f32 %v1351_v15, %v2265_v46 }
 0x346   :  { %v1353_v16 = vpop.f32.mrb[11].mxu1 }
 0x347   :  { %v1354_v17 = vadd.f32 %v1353_v16, %v1352_v42 }
 0x349   :  { %v1355_v18 = vpop.f32.mrb[12].mxu1  ;;  %v713_v43 = vadd.f32 %v1354_v17, %v2265_v46 }
 0x34a   :  { %v1356_v19 = vpop.f32.mrb[13].mxu1 }
 0x34b   :  { %v1357_v20 = vadd.f32 %v1356_v19, %v1355_v18 }
 0x34d   :  { %v1358_v21 = vpop.f32.mrb[14].mxu1  ;;  %v718_v34 = vadd.f32 %v1357_v20, %v2265_v46 }
 0x34e   :  { %v1359_v22 = vpop.f32.mrb[15].mxu1 }
 0x34f   :  { %v1360_v23 = vadd.f32 %v1359_v22, %v1358_v21 }
 0x351   :  { %v1361_v25 = vpop.f32.mrb[16].mxu1  ;;  %v723_v6 = vadd.f32 %v1360_v23, %v2265_v46 }
 0x352   :  { %v1362_v26 = vpop.f32.mrb[17].mxu1 }
 0x353   :  { %v2267_v27 = vadd.f32 %v1362_v26, %v1361_v25 }
 0x355   :  { %v797_v33 = vpop.f32.mrb[18].mxu1  ;;  %v728_v13 = vadd.f32 %v2267_v27, %v2265_v46 }
 0x356   :  { %v798_v54 = vadd.f32 %v797_v33, %v688_v30  ;;  %v1416_v35 = vpop.f32.mrb[19].mxu1 }
 0x358   :  { %842 = vst.msk [vmem:[#allocation4] sm:$0xff] %vm841_vm6, %v798_v54 }
 0x359   :  { %v802_v58 = vpop.f32.mrb[20].mxu1 }
 0x35a   :  { %v803_v39 = vadd.f32 %v802_v58, %v693_v36  ;;  %v1419_v40 = vpop.f32.mrb[21].mxu1 }
 0x35c   :  { %843 = vst.msk [vmem:[#allocation4 + $0x8] sm:$0xff] %vm841_vm6, %v803_v39 }
 0x35d   :  { %v807_v62 = vpop.f32.mrb[22].mxu1 }
 0x35e   :  { %v808_v44 = vadd.f32 %v807_v62, %v698_v41  ;;  %v1422_v24 = vpop.f32.mrb[23].mxu1  ;;  %v1093_v41 = vld [vmem:[%s2376_s7] sm:$0xff]  ;;  %v1094_v62 = vld [vmem:[%s2376_s7 + $0x8] sm:$0xff] }
 0x35f   :  { %v2281_v45 = vld [vmem:[#allocation4] sm:$0xff]  ;;  %v1095_v24 = vld [vmem:[%s2376_s7 + $0x10] sm:$0xff] }
 0x360   :  { %844 = vst.msk [vmem:[#allocation4 + $0x10] sm:$0xff] %vm841_vm6, %v808_v44  ;;  %865 = vrot.lane.b32.xlu0 %v2281_v45, %s1597_s0  ;;  %v1575_v44 = vpack.c.bf16 %v1094_v62, %v1093_v41 }
 0x361   :  { %v812_v3 = vpop.f32.mrb[24].mxu1 }
 0x362   :  { %v813_v51 = vadd.f32 %v812_v3, %v703_v47  ;;  %v1425_v52 = vpop.f32.mrb[25].mxu1  ;;  %v1178_v47 = vld [vmem:[%s2377_s9] sm:$0xff]  ;;  %v1179_v3 = vld [vmem:[%s2377_s9 + $0x8] sm:$0xff] }
 0x363   :  { %v852_v11 = vld [vmem:[#allocation4 + $0x8] sm:$0xff]  ;;  %v1581_v49 = vpack.c.bf16 %v1179_v3, %v1178_v47 }
 0x364   :  { %845 = vst.msk [vmem:[#allocation4 + $0x18] sm:$0xff] %vm841_vm6, %v813_v51 }
 0x365   :  { %v817_v60 = vpop.f32.mrb[26].mxu1 }
 0x366   :  { %v818_v37 = vadd.f32 %v817_v60, %v708_v57  ;;  %v1428_v61 = vpop.f32.mrb[27].mxu1  ;;  %v1180_v60 = vld [vmem:[%s2377_s9 + $0x10] sm:$0xff] }
 0x367   :  { %v853_v8 = vld [vmem:[#allocation4 + $0x10] sm:$0xff]  ;;  %v1301_v61 = vld [vmem:[%s2379_s8] ss:$0 sm:$0xff] }
 0x368   :  { %846 = vst.msk [vmem:[#allocation4 + $0x20] sm:$0xff] %vm841_vm6, %v818_v37  ;;  %869 = vrot.lane.b32.xlu1 %v853_v8, %s1597_s0 }
 0x369   :  { %v822_v48 = vpop.f32.mrb[28].mxu1 }
 0x36a   :  { %v823_v53 = vadd.f32 %v822_v48, %v713_v43  ;;  %v1431_v63 = vpop.f32.mrb[29].mxu1 }
 0x36b   :  { %v854_v17 = vld [vmem:[#allocation4 + $0x18] sm:$0xff]  ;;  %v1303_v63 = vld [vmem:[%s2380_s10] ss:$0 sm:$0xff] }
 0x36c   :  { %847 = vst.msk [vmem:[#allocation4 + $0x28] sm:$0xff] %vm841_vm6, %v823_v53 }
 0x36d   :  { %v827_v0 = vpop.f32.mrb[30].mxu1 }
 0x36e   :  { %v828_v38 = vadd.f32 %v827_v0, %v718_v34  ;;  %v1434_v9 = vpop.f32.mrb[31].mxu1 }
 0x36f   :  { %v855_v4 = vld [vmem:[#allocation4 + $0x20] sm:$0xff] }
 0x370   :  { %848 = vst.msk [vmem:[#allocation4 + $0x30] sm:$0xff] %vm841_vm6, %v828_v38  ;;  %873 = vrot.lane.b32.xlu0 %v855_v4, %s1597_s0 }
 0x371   :  { %v832_v5 = vpop.f32.mrb[32].mxu1 }
 0x372   :  { %v833_v12 = vadd.f32 %v832_v5, %v723_v6  ;;  %v1437_v10 = vpop.f32.mrb[33].mxu1 }
 0x373   :  { %v856_v42 = vld [vmem:[#allocation4 + $0x28] sm:$0xff] }
 0x374   :  { %849 = vst.msk [vmem:[#allocation4 + $0x38] sm:$0xff] %vm841_vm6, %v833_v12  ;;  %867 = vrot.lane.b32.xlu0 %v852_v11, %s1597_s0 }
 0x375   :  { %v837_v14 = vpop.f32.mrb[34].mxu1 }
 0x376   :  { %v838_v56 = vadd.f32 %v837_v14, %v728_v13  ;;  %v1440_v15 = vpop.f32.mrb[35].mxu1 }
 0x377   :  { %v857_v16 = vld [vmem:[#allocation4 + $0x30] sm:$0xff] }
 0x378   :  { %850 = vst.msk [vmem:[#allocation4 + $0x40] sm:$0xff] %vm841_vm6, %v838_v56  ;;  %875 = vrot.lane.b32.xlu0 %v856_v42, %s1597_s0  ;;  %877 = vrot.lane.b32.xlu1 %v857_v16, %s1597_s0 }
 0x37b   :  { %v893_v18 = vld [vmem:[#allocation4 + $0x38] sm:$0xff] }
 0x37c   :  { %871 = vrot.lane.b32.xlu1 %v854_v17, %s1597_s0 }
 0x37f   :  { %v894_v19 = vld [vmem:[#allocation4 + $0x40] sm:$0xff] }
 0x380   :  { %897 = vrot.lane.b32.xlu1 %v893_v18, %s1597_s0  ;;  %899 = vrot.lane.b32.xlu0 %v894_v19, %s1597_s0 }
 0x3d2   :  { %v866_v20 = vpop.permute.xlu0 %865 }
 0x3d3   :  { %v886_v22 = vmax.f32 %v2281_v45, %v866_v20 }
 0x3da   :  { %v870_v21 = vpop.permute.xlu1 %869 }
 0x3db   :  { %v888_v23 = vmax.f32 %v853_v8, %v870_v21 }
 0x3dd   :  { %v905_v25 = vmax.f32 %v886_v22, %v888_v23 }
 0x3df   :  { %v912_v46 = vmax.f32 %v905_v25, 0.0 }
 0x3e1   :  { %920 = vst.msk [vmem:[#allocation5] sm:$0xff] %vm919_vm7, %v912_v46 }
 0x3e2   :  { %v874_v26 = vpop.permute.xlu0 %873 }
 0x3e3   :  { %v890_v27 = vmax.f32 %v855_v4, %v874_v26 }
 0x3e6   :  { %v868_v29 = vpop.permute.xlu0 %867 }
 0x3e8   :  { %v927_v50 = vld [vmem:[#allocation5] sm:$0xff] }
 0x3e9   :  { %1461 = vmatmul.mubr.msk.f32.vlgmr.msra.gmra.mrb[36].mxu1 %vm919_vm7, %v927_v50 }
 0x3ea   :  { %v878_v30 = vpop.permute.xlu1 %877  ;;  %1482 = vmatprep.mubr.msk.f32.mxu1 %vm1600_vm3, %v1601_v1  ;;  %v876_v33 = vpop.permute.xlu0 %875  ;;  %1582 = vmatpush3.bf16.msra.mxu1 %v1581_v49 }
 0x3eb   :  { %v892_v31 = vmax.f32 %v857_v16, %v878_v30  ;;  %1583 = vmatprep.subr.bf16.mxu1 %v1595_v2 }
 0x3ed   :  { %v909_v54 = vmax.f32 %v890_v27, %v892_v31 }
 0x3ee   :  { %v872_v35 = vpop.permute.xlu1 %871 }
 0x3ef   :  { %v916_v36 = vmax.f32 %v909_v54, 0.0 }
 0x3f1   :  { %924 = vst.msk [vmem:[#allocation5 + $0x20] sm:$0xff] %vm919_vm7, %v916_v36 }
 0x3f2   :  { %v898_v58 = vpop.permute.xlu1 %897  ;;  %v900_v39 = vpop.permute.xlu0 %899 }
 0x3f8   :  { %v932_v40 = vld [vmem:[#allocation5 + $0x20] sm:$0xff] }
 0x3f9   :  { %1450 = vmatmul.mubr.msk.f32.vlgmr.msra.gmra.mrb[28].mxu0 %vm919_vm7, %v932_v40 }
 0x3fa   :  { %1471 = vmatprep.mubr.msk.f32.mxu0 %vm1600_vm3, %v1601_v1  ;;  %1576 = vmatpush3.bf16.msra.mxu0 %v1575_v44  ;;  %v1096_v1 = vld [vmem:[%s2376_s7 + $0x18] sm:$0xff] }
 0x3fb   :  { %1577 = vmatprep.subr.bf16.mxu0 %v1595_v2  ;;  %v1578_v45 = vpack.c.bf16 %v1096_v1, %v1095_v24  ;;  %v1181_v2 = vld [vmem:[%s2377_s9 + $0x18] sm:$0xff] }
 0x3fc   :  { %v1584_v37 = vpack.c.bf16 %v1181_v2, %v1180_v60 }
 0x3fe   :  { %1579 = vmatpush3.bf16.msra.mxu0 %v1578_v45  ;;  %1585 = vmatpush3.bf16.msra.mxu1 %v1584_v37 }
 0x4bc   :  { %v1080_v28 = vpop.f32.mrb[36].mxu1 }
 0x4bd   :  { %v1462_v51 = vpop.f32.mrb[37].mxu1 }
 0x4cc   :  { %v1007_v52 = vpop.f32.mrb[28].mxu0 }
 0x4cd   :  { %v1081_v55 = vadd.f32 %v1080_v28, %v1007_v52  ;;  %v1451_v32 = vpop.f32.mrb[29].mxu0 }
 0x4cf   :  { %v1091_v57 = vadd.f32 %v1300_v7, %v1081_v55 }
 0x4d1   :  { %v1092_v59 = vmax.f32 %v1091_v57, 0.0 }
 0x4d3   :  { %1472 = vmatmul.mubr.msk.f32.vlgmr.msra.gmra.mrb[30].mxu0 %vm919_vm7, %v1092_v59 }
 0x5a6   :  { %v1173_v8 = vpop.f32.mrb[30].mxu0 }
 0x5a7   :  { %v1174_v43 = vadd.f32 %v1301_v61, %v1173_v8  ;;  %v1473_v48 = vpop.f32.mrb[31].mxu0 }
 0x5a9   :  { %v1177_v53 = vmax.f32 %v1174_v43, 0.0 }
 0x5ab   :  { %1483 = vmatmul.mubr.msk.f32.vlgmr.msra.gmra.mrb[38].mxu1 %vm919_vm7, %v1177_v53 }
 0x67e   :  { %v1258_v34 = vpop.f32.mrb[38].mxu1 }
 0x67f   :  { %v1259_v0 = vadd.f32 %v1303_v63, %v1258_v34  ;;  %v1484_v38 = vpop.f32.mrb[39].mxu1 }
 0x681   :  { %1593 = vtanh.f32 %v1259_v0 }
 0x68b   :  { %v1594_v9 = vpop.eup %1593 }
 0x68c   :  { %1264 = vst.msk [vmem:[%s2381_s11] sm:$0xff] %vm1263_vm8, %v1594_v9 }

</bundles_post_ra>
